<compile_context>
chip_gen: v5e
topology: v5e:2x2
jax: 0.10.0
libtpu: 0.0.40
codegen_flags: <defaults>
</compile_context>

<pallas_src>
import jax
import jax.numpy as jnp
from jax.experimental import pallas as pl
from jax.experimental.pallas import tpu as pltpu

# ---------------- small, self-consistent configuration ----------------
N = 2            # samples
M = 2            # num_person
T = 8            # temporal frames
V = 4            # vertices / joints
C = 4            # in_channels == base_channels == V (makes the forward runnable)
NUM_STAGES = 3   # -> 2 STGATBlocks (in_channels == base_channels path)
NB = NUM_STAGES - 1
K_TCN = 9        # unit_tcn temporal kernel size
LEAKY_ALPHA = 0.01
BN_EPS = 1e-5
NEG_INF = -1.0e9
B = N * M        # batch seen by the kernel
NN = C * T       # number of graph "nodes" per sample (= S*T)
GRP = B * T      # lanes per channel group
LANES = C * GRP  # 128: lane index L = c*GRP + b*T + t
assert LANES == 128 and C == V, "toy config assumes a 128-lane, square (C==V) state"


# =====================================================================
# Kernel helpers
# =====================================================================
def _chunk_transpose(x):
    """(C, 128) -> (C, 128): out[k, g*GRP + r] = x[g, k*GRP + r].

    Transposes the 4x4 grid of 32-lane chunks, i.e. swaps the sublane axis with the
    leading lane-group index.  This is the model's inherent channel<->vertex role swap
    between the GAT output and the TCN input; 16 static 32-lane slices + 5 concats."""
    cols = []
    for g in range(C):
        rows = [x[g:g + 1, k * GRP:(k + 1) * GRP] for k in range(C)]
        cols.append(jnp.concatenate(rows, axis=0))          # (C, GRP)
    return jnp.concatenate(cols, axis=1)                     # (C, 128)


# =====================================================================
# Single fused kernel: data_bn + NB x (GraphAttentionLayer -> unit_tcn
# (block-diagonal matmul, BN folded) -> residual -> ReLU).  No grid.
# State layout: h[v, c*GRP + b*T + t] == x[b, c, t, v]   (V, C*B*T) = (4, 128).
# =====================================================================
def _stgat_kernel(h_ref, dbs_ref, dbb_ref, maskt_ref, waug_ref, baug_ref,
                  bd_ref, shift_ref, o_ref):
    # data_bn ('VC', inference): per-(v, c) affine, folded on the host.
    h = h_ref[...] * dbs_ref[...] + dbb_ref[...]                   # (4, 128)
    adj_ok = maskt_ref[...] > 0.0                                  # hoisted (128, 128)

    for blk in range(NB):
        # -------- GraphAttentionLayer (all batches at once, block-diagonal) --------
        # One matmul gives Wh^T (rows 0..C-1), Wh1 (row C) and Wh2 (row C+1).
        z = jnp.dot(waug_ref[blk], h,
                    preferred_element_type=jnp.float32) + baug_ref[blk]   # (8, 128)
        whT = z[0:C, :]                                            # (C, 128): [c_out; i]
        wh1 = z[C:C + 1, :]                                        # (1, 128): over i
        wh2c = jnp.transpose(z[C + 1:C + 2, :], (1, 0))            # (128, 1): over j
        # Work with the TRANSPOSED attention (rows = j, cols = i) so that applying it
        # is a plain (C,128)@(128,128) matmul with no operand transposes.
        e_t = wh1 + wh2c                                           # e[i,j]^T = (128,128)
        e_t = jnp.where(e_t > 0, e_t, LEAKY_ALPHA * e_t)           # LeakyReLU
        logits = jnp.where(adj_ok, e_t, NEG_INF)                   # adjacency+batch mask
        logits = logits - jnp.max(logits, axis=0, keepdims=True)   # softmax over j
        p = jnp.exp(logits)                                        # cross-batch -> 0.0
        inv = pl.reciprocal(jnp.sum(p, axis=0, keepdims=True), approx=True)
        att_t = p * inv                                            # attention^T
        # TODO(synk): F.dropout(p=0.6) on the attention is a no-op in eval mode.
        h_hat = jnp.dot(whT, att_t,
                        preferred_element_type=jnp.float32)        # (C, 128) = h_hat^T
        g = jnp.where(h_hat > 0, h_hat,
                      jnp.exp(jnp.minimum(h_hat, 0.0)) - 1.0)      # ELU (overflow-safe)

        # -------- unit_tcn + BatchNorm + residual + ReLU --------
        # TODO(synk): the reference feeds the 3-D GAT output straight into Conv2d
        # (shape bug); as before we reinterpret (B, C, T, Cout) -> NCHW (B, Cout, T, C).
        # Conv(9,1) + BN scale + zero time-padding + that reinterpretation are folded on
        # the host into the block-diagonal bd operator; gp puts (ci, tau) on the lane
        # (contraction) axis so the whole TCN is one 128-lane matmul.
        gp = _chunk_transpose(g)                                   # (C, 128)
        tcn = jnp.dot(gp, bd_ref[blk],
                      preferred_element_type=jnp.float32)          # (C, 128) -> H layout
        h = jnp.maximum(tcn + shift_ref[blk] + h, 0.0)             # +shift +residual, ReLU

    o_ref[...] = h                                                 # lane-dense (4, 128)


# =====================================================================
# Wrapper: one pallas_call for the whole forward.  Layout conversion to
# and from the module's (N, M, T, V, C) / (N, M, C, T, V) shapes happens
# once in XLA outside the kernel.
# =====================================================================
def stgat_forward(x, params):
    n, m, t, v, c = x.shape
    b = n * m
    # (N, M, T, V, C) -> (V, C, N, M, T) -> (V, C*B*T): lane order (c, b, t).
    h0 = jnp.transpose(x, (3, 4, 0, 1, 2)).reshape(v, c * b * t)
    out = pl.pallas_call(
        _stgat_kernel,
        out_shape=jax.ShapeDtypeStruct((v, c * b * t), jnp.float32),
        in_specs=[pl.BlockSpec(memory_space=pltpu.MemorySpace.VMEM)] * 8,
        out_specs=pl.BlockSpec(memory_space=pltpu.MemorySpace.VMEM),
    )(h0, params["dbn_scale"], params["dbn_shift"], params["mask_t"],
      params["waug"], params["baug"], params["bd"], params["shift"])
    # (V, C*B*T) -> (V, C, N, M, T) -> (N, M, C, T, V), the reference output layout.
    return jnp.transpose(out.reshape(v, c, n, m, t), (2, 3, 1, 4, 0))


# =====================================================================
# Deterministic parameter construction (synthetic, no checkpoint) and
# host-side folding of the per-block operators.
# =====================================================================
def _xavier(key, out_f, in_f, gain=1.414):
    a = gain * (6.0 / (in_f + out_f)) ** 0.5
    return jax.random.uniform(key, (out_f, in_f), jnp.float32, -a, a)


def _uniform(key, shape, bound):
    return jax.random.uniform(key, shape, jnp.float32, -bound, bound)


def init_gat_params(key, in_f, out_f):
    # TODO(synk): module declares in_feature = A.size*in_channels; runtime requires in_feature = V.
    k = jax.random.split(key, 6)
    w = _xavier(k[0], out_f, in_f)                         # Wlinear weight (out, in)
    bw = _uniform(k[1], (out_f,), 1.0 / in_f ** 0.5)
    ai = _xavier(k[2], 1, out_f)
    bi = _uniform(k[3], (1,), 1.0 / out_f ** 0.5)
    aj = _xavier(k[4], 1, out_f)
    bj = _uniform(k[5], (1,), 1.0 / out_f ** 0.5)
    return w, bw, ai, bi, aj, bj


def build_gat_operator(w, bw, ai, bi, aj, bj):
    """Fold Wlinear + aiLinear + ajLinear into one (8, V) projection; rows 0..C-1 give
    Wh^T, row C gives Wh1 (aiLinear(Wh)), row C+1 gives Wh2 (ajLinear(Wh))."""
    waug = jnp.zeros((8, V), jnp.float32)
    waug = waug.at[0:C].set(w)
    waug = waug.at[C].set((ai @ w)[0])
    waug = waug.at[C + 1].set((aj @ w)[0])
    baug = jnp.zeros((8, 1), jnp.float32)
    baug = baug.at[0:C, 0].set(bw)
    baug = baug.at[C, 0].set(ai[0] @ bw + bi[0])
    baug = baug.at[C + 1, 0].set(aj[0] @ bw + bj[0])
    return waug, baug


def init_tcn_params(key, c_in, c_out, k_size):
    ks = jax.random.split(key, 6)
    bound = 1.0 / (c_in * k_size) ** 0.5
    w = _uniform(ks[0], (c_out, c_in, k_size), bound)      # Conv2d weight (ks,1) squeezed
    bias = _uniform(ks[1], (c_out,), bound)
    gamma = 1.0 + 0.1 * jax.random.normal(ks[2], (c_out,), jnp.float32)
    beta = 0.1 * jax.random.normal(ks[3], (c_out,), jnp.float32)
    mean = 0.1 * jax.random.normal(ks[4], (c_out,), jnp.float32)
    var = 1.0 + 0.1 * jax.random.uniform(ks[5], (c_out,), jnp.float32)
    scale = gamma / jnp.sqrt(var + BN_EPS)                 # fold conv bias + BN affine
    shift = bias * scale + beta - mean * scale
    return w, scale, shift


def build_tcn_operator(w, scale, shift):
    """Fold the (9,1) temporal conv (+ BN scale, zero time padding) and the GAT->TCN
    axis reinterpretation into one block-diagonal (C*B*T, C*B*T) operator acting on the
    lane-packed layout [ci, b, tau] -> [co, b, t_o], plus the per-lane BN shift row."""
    c_out, c_in, k = w.shape
    pad = (k - 1) // 2
    tau = jnp.arange(T)[:, None]            # input frame
    t_o = jnp.arange(T)[None, :]            # output frame
    kidx = tau - t_o + pad                  # (T, T)
    valid = ((kidx >= 0) & (kidx < k)).astype(jnp.float32)
    kidx = jnp.clip(kidx, 0, k - 1)
    w_sc = w * scale[:, None, None]                         # (Co, Ci, K)
    blocks = w_sc[:, :, kidx] * valid                       # (Co, Ci, T, T): [co,ci,tau,t_o]
    small = jnp.transpose(blocks, (1, 2, 0, 3))             # (Ci, T, Co, T): [ci,tau,co,t_o]
    eyeb = jnp.eye(B, dtype=jnp.float32)                    # block-diagonal over batch
    big = small[:, None, :, :, None, :] * eyeb[None, :, None, None, :, None]
    bd = big.reshape(c_in * B * T, c_out * B * T)           # (128, 128)
    shift_row = jnp.repeat(shift, B * T).reshape(1, c_out * B * T)
    return bd, shift_row


def init_data_bn(key, ch):
    ks = jax.random.split(key, 4)
    gamma = 1.0 + 0.1 * jax.random.normal(ks[0], (ch,), jnp.float32)
    beta = 0.1 * jax.random.normal(ks[1], (ch,), jnp.float32)
    mean = 0.1 * jax.random.normal(ks[2], (ch,), jnp.float32)
    var = 1.0 + 0.1 * jax.random.uniform(ks[3], (ch,), jnp.float32)
    s = gamma / jnp.sqrt(var + BN_EPS)                      # BatchNorm1d('VC'), inference
    sh = beta - mean * s
    return s, sh


def make_adjacency():
    # TODO(synk): Graph class not provided; synthetic adjacency over the S*T node set
    # (connect nodes sharing a channel or a time step, incl. self-loops).
    idx = jnp.arange(NN)
    ch, tm = idx // T, idx % T
    adj = (ch[:, None] == ch[None, :]) | (tm[:, None] == tm[None, :])
    return adj.astype(jnp.float32)


def build_attention_mask(adj):
    """(128,128) mask for the TRANSPOSED attention logits: mask[j_lane, i_lane] = 1 iff
    same batch and adj[node(i), node(j)] > 0 (block-diagonalizes the batch exactly)."""
    lane = jnp.arange(LANES)
    c_of, r = lane // GRP, lane % GRP
    b_of, t_of = r // T, r % T
    n_of = c_of * T + t_of
    adj_ij = adj[n_of[None, :], n_of[:, None]]              # [j, i] -> adj[n(i), n(j)]
    same_b = (b_of[:, None] == b_of[None, :]).astype(jnp.float32)
    return adj_ij * same_b


def init_params(key):
    k_bn, k_blocks = jax.random.split(key)
    s, sh = init_data_bn(k_bn, V * C)
    # channel index of the 'VC' BatchNorm1d is v*C + c; broadcast over (b, t) -> (V, 128)
    dbn_scale = jnp.repeat(s.reshape(V, C), GRP, axis=1)
    dbn_shift = jnp.repeat(sh.reshape(V, C), GRP, axis=1)

    waugs, baugs, bds, shifts = [], [], [], []
    for bk in jax.random.split(k_blocks, NB):
        kg, kt = jax.random.split(bk)
        waug, baug = build_gat_operator(*init_gat_params(kg, V, C))
        bd, shift_row = build_tcn_operator(*init_tcn_params(kt, C, C, K_TCN))
        waugs.append(waug); baugs.append(baug)
        bds.append(bd); shifts.append(shift_row)

    return dict(dbn_scale=dbn_scale, dbn_shift=dbn_shift,
                mask_t=build_attention_mask(make_adjacency()),
                waug=jnp.stack(waugs), baug=jnp.stack(baugs),
                bd=jnp.stack(bds), shift=jnp.stack(shifts))


if __name__ == "__main__":
    key = jax.random.PRNGKey(0)
    kx, kp = jax.random.split(key)
    x = jax.random.normal(kx, (N, M, T, V, C), jnp.float32)   # STGAT input (N, M, T, V, C)
    params = init_params(kp)
    out = jax.jit(stgat_forward)(x, params)
    out = jax.block_until_ready(out)
    assert out.shape == (N, M, C, T, V), out.shape
    assert bool(jnp.all(jnp.isfinite(out)))
    print("KERNEL_OK")
</pallas_src>

<mosaic_0001>
module attributes {stable_mosaic.version = 11 : i64} {
  func.func @_stgat_kernel(%arg0: memref<4x128xf32, #tpu.memory_space<vmem>>, %arg1: memref<4x128xf32, #tpu.memory_space<vmem>>, %arg2: memref<4x128xf32, #tpu.memory_space<vmem>>, %arg3: memref<128x128xf32, #tpu.memory_space<vmem>>, %arg4: memref<2x8x4xf32, #tpu.memory_space<vmem>>, %arg5: memref<2x8x1xf32, #tpu.memory_space<vmem>>, %arg6: memref<2x128x128xf32, #tpu.memory_space<vmem>>, %arg7: memref<2x1x128xf32, #tpu.memory_space<vmem>>, %arg8: memref<4x128xf32, #tpu.memory_space<vmem>>) attributes {dimension_semantics = [], scalar_prefetch = 0 : i64, scratch_operands = 0 : i64, tpu.core_type = #tpu.core_type<tc>} {
    %c0 = arith.constant 0 : index
    %c0_0 = arith.constant 0 : index
    %0 = vector.load %arg0[%c0, %c0_0] : memref<4x128xf32, #tpu.memory_space<vmem>>, vector<4x128xf32>
    %c0_1 = arith.constant 0 : index
    %c0_2 = arith.constant 0 : index
    %1 = vector.load %arg1[%c0_1, %c0_2] : memref<4x128xf32, #tpu.memory_space<vmem>>, vector<4x128xf32>
    %2 = arith.mulf %0, %1 : vector<4x128xf32>
    %c0_3 = arith.constant 0 : index
    %c0_4 = arith.constant 0 : index
    %3 = vector.load %arg2[%c0_3, %c0_4] : memref<4x128xf32, #tpu.memory_space<vmem>>, vector<4x128xf32>
    %4 = arith.addf %2, %3 : vector<4x128xf32>
    %c0_5 = arith.constant 0 : index
    %c0_6 = arith.constant 0 : index
    %5 = vector.load %arg3[%c0_5, %c0_6] : memref<128x128xf32, #tpu.memory_space<vmem>>, vector<128x128xf32>
    %cst = arith.constant 0.000000e+00 : f32
    %6 = vector.broadcast %cst : f32 to vector<128x128xf32>
    %7 = arith.cmpf ogt, %5, %6 : vector<128x128xf32>
    %c0_7 = arith.constant 0 : index
    %c0_8 = arith.constant 0 : index
    %c0_9 = arith.constant 0 : index
    %8 = vector.load %arg4[%c0_7, %c0_8, %c0_9] : memref<2x8x4xf32, #tpu.memory_space<vmem>>, vector<1x8x4xf32>
    %9 = vector.shape_cast %8 : vector<1x8x4xf32> to vector<8x4xf32>
    %cst_10 = arith.constant dense<0.000000e+00> : vector<8x128xf32>
    %10 = tpu.matmul %9, %4, %cst_10 {dimension_numbers = #tpu.dot_dimension_numbers<[1], [0], [0], [1], [0, 0, 1, 1], [], []>} : vector<8x4xf32>, vector<4x128xf32>, vector<8x128xf32> -> vector<8x128xf32>
    %c0_11 = arith.constant 0 : index
    %c0_12 = arith.constant 0 : index
    %c0_13 = arith.constant 0 : index
    %11 = vector.load %arg5[%c0_11, %c0_12, %c0_13] : memref<2x8x1xf32, #tpu.memory_space<vmem>>, vector<1x8x1xf32>
    %12 = vector.shape_cast %11 : vector<1x8x1xf32> to vector<8x1xf32>
    %13 = vector.broadcast %12 : vector<8x1xf32> to vector<8x128xf32>
    %14 = arith.addf %10, %13 : vector<8x128xf32>
    %15 = vector.extract_strided_slice %14 {offsets = [0, 0], sizes = [4, 128], strides = [1, 1]} : vector<8x128xf32> to vector<4x128xf32>
    %16 = vector.extract_strided_slice %14 {offsets = [4, 0], sizes = [1, 128], strides = [1, 1]} : vector<8x128xf32> to vector<1x128xf32>
    %17 = vector.extract_strided_slice %14 {offsets = [5, 0], sizes = [1, 128], strides = [1, 1]} : vector<8x128xf32> to vector<1x128xf32>
    %18 = tpu.transpose %17, [1, 0] : vector<1x128xf32> -> vector<128x1xf32>
    %19 = vector.broadcast %16 : vector<1x128xf32> to vector<128x128xf32>
    %20 = vector.broadcast %18 : vector<128x1xf32> to vector<128x128xf32>
    %21 = arith.addf %19, %20 : vector<128x128xf32>
    %cst_14 = arith.constant 0.000000e+00 : f32
    %22 = vector.broadcast %cst_14 : f32 to vector<128x128xf32>
    %23 = arith.cmpf ogt, %21, %22 : vector<128x128xf32>
    %cst_15 = arith.constant 0.00999999977 : f32
    %24 = vector.broadcast %cst_15 : f32 to vector<128x128xf32>
    %25 = arith.mulf %24, %21 : vector<128x128xf32>
    %26 = arith.select %23, %21, %25 : vector<128x128xi1>, vector<128x128xf32>
    %cst_16 = arith.constant -1.000000e+09 : f32
    %27 = vector.broadcast %cst_16 : f32 to vector<128x128xf32>
    %28 = arith.select %7, %26, %27 : vector<128x128xi1>, vector<128x128xf32>
    %cst_17 = arith.constant dense<0xFF800000> : vector<128xf32>
    %29 = vector.multi_reduction <maximumf>, %28, %cst_17 [0] : vector<128x128xf32> to vector<128xf32>
    %30 = vector.shape_cast %29 : vector<128xf32> to vector<1x128xf32>
    %31 = vector.broadcast %30 : vector<1x128xf32> to vector<128x128xf32>
    %32 = arith.subf %28, %31 : vector<128x128xf32>
    %33 = math.exp %32 : vector<128x128xf32>
    %cst_18 = arith.constant dense<0.000000e+00> : vector<128xf32>
    %34 = vector.multi_reduction <add>, %33, %cst_18 [0] : vector<128x128xf32> to vector<128xf32>
    %35 = vector.shape_cast %34 : vector<128xf32> to vector<1x128xf32>
    %36 = tpu.reciprocal %35 {approx = true} : vector<1x128xf32> -> vector<1x128xf32>
    %37 = vector.broadcast %36 : vector<1x128xf32> to vector<128x128xf32>
    %38 = arith.mulf %33, %37 : vector<128x128xf32>
    %cst_19 = arith.constant dense<0.000000e+00> : vector<4x128xf32>
    %39 = tpu.matmul %15, %38, %cst_19 {dimension_numbers = #tpu.dot_dimension_numbers<[1], [0], [0], [1], [0, 0, 1, 1], [], []>} : vector<4x128xf32>, vector<128x128xf32>, vector<4x128xf32> -> vector<4x128xf32>
    %cst_20 = arith.constant 0.000000e+00 : f32
    %40 = vector.broadcast %cst_20 : f32 to vector<4x128xf32>
    %41 = arith.cmpf ogt, %39, %40 : vector<4x128xf32>
    %cst_21 = arith.constant 0.000000e+00 : f32
    %42 = vector.broadcast %cst_21 : f32 to vector<4x128xf32>
    %43 = arith.minimumf %39, %42 : vector<4x128xf32>
    %44 = math.exp %43 : vector<4x128xf32>
    %cst_22 = arith.constant 1.000000e+00 : f32
    %45 = vector.broadcast %cst_22 : f32 to vector<4x128xf32>
    %46 = arith.subf %44, %45 : vector<4x128xf32>
    %47 = arith.select %41, %39, %46 : vector<4x128xi1>, vector<4x128xf32>
    %48 = vector.extract_strided_slice %47 {offsets = [0, 0], sizes = [1, 32], strides = [1, 1]} : vector<4x128xf32> to vector<1x32xf32>
    %49 = vector.extract_strided_slice %47 {offsets = [0, 32], sizes = [1, 32], strides = [1, 1]} : vector<4x128xf32> to vector<1x32xf32>
    %50 = vector.extract_strided_slice %47 {offsets = [0, 64], sizes = [1, 32], strides = [1, 1]} : vector<4x128xf32> to vector<1x32xf32>
    %51 = vector.extract_strided_slice %47 {offsets = [0, 96], sizes = [1, 32], strides = [1, 1]} : vector<4x128xf32> to vector<1x32xf32>
    %52 = tpu.concatenate %48, %49, %50, %51 in 0 : vector<1x32xf32>, vector<1x32xf32>, vector<1x32xf32>, vector<1x32xf32> -> vector<4x32xf32>
    %53 = vector.extract_strided_slice %47 {offsets = [1, 0], sizes = [1, 32], strides = [1, 1]} : vector<4x128xf32> to vector<1x32xf32>
    %54 = vector.extract_strided_slice %47 {offsets = [1, 32], sizes = [1, 32], strides = [1, 1]} : vector<4x128xf32> to vector<1x32xf32>
    %55 = vector.extract_strided_slice %47 {offsets = [1, 64], sizes = [1, 32], strides = [1, 1]} : vector<4x128xf32> to vector<1x32xf32>
    %56 = vector.extract_strided_slice %47 {offsets = [1, 96], sizes = [1, 32], strides = [1, 1]} : vector<4x128xf32> to vector<1x32xf32>
    %57 = tpu.concatenate %53, %54, %55, %56 in 0 : vector<1x32xf32>, vector<1x32xf32>, vector<1x32xf32>, vector<1x32xf32> -> vector<4x32xf32>
    %58 = vector.extract_strided_slice %47 {offsets = [2, 0], sizes = [1, 32], strides = [1, 1]} : vector<4x128xf32> to vector<1x32xf32>
    %59 = vector.extract_strided_slice %47 {offsets = [2, 32], sizes = [1, 32], strides = [1, 1]} : vector<4x128xf32> to vector<1x32xf32>
    %60 = vector.extract_strided_slice %47 {offsets = [2, 64], sizes = [1, 32], strides = [1, 1]} : vector<4x128xf32> to vector<1x32xf32>
    %61 = vector.extract_strided_slice %47 {offsets = [2, 96], sizes = [1, 32], strides = [1, 1]} : vector<4x128xf32> to vector<1x32xf32>
    %62 = tpu.concatenate %58, %59, %60, %61 in 0 : vector<1x32xf32>, vector<1x32xf32>, vector<1x32xf32>, vector<1x32xf32> -> vector<4x32xf32>
    %63 = vector.extract_strided_slice %47 {offsets = [3, 0], sizes = [1, 32], strides = [1, 1]} : vector<4x128xf32> to vector<1x32xf32>
    %64 = vector.extract_strided_slice %47 {offsets = [3, 32], sizes = [1, 32], strides = [1, 1]} : vector<4x128xf32> to vector<1x32xf32>
    %65 = vector.extract_strided_slice %47 {offsets = [3, 64], sizes = [1, 32], strides = [1, 1]} : vector<4x128xf32> to vector<1x32xf32>
    %66 = vector.extract_strided_slice %47 {offsets = [3, 96], sizes = [1, 32], strides = [1, 1]} : vector<4x128xf32> to vector<1x32xf32>
    %67 = tpu.concatenate %63, %64, %65, %66 in 0 : vector<1x32xf32>, vector<1x32xf32>, vector<1x32xf32>, vector<1x32xf32> -> vector<4x32xf32>
    %68 = tpu.concatenate %52, %57, %62, %67 in 1 : vector<4x32xf32>, vector<4x32xf32>, vector<4x32xf32>, vector<4x32xf32> -> vector<4x128xf32>
    %c0_23 = arith.constant 0 : index
    %c0_24 = arith.constant 0 : index
    %c0_25 = arith.constant 0 : index
    %69 = vector.load %arg6[%c0_23, %c0_24, %c0_25] : memref<2x128x128xf32, #tpu.memory_space<vmem>>, vector<1x128x128xf32>
    %70 = vector.shape_cast %69 : vector<1x128x128xf32> to vector<128x128xf32>
    %cst_26 = arith.constant dense<0.000000e+00> : vector<4x128xf32>
    %71 = tpu.matmul %68, %70, %cst_26 {dimension_numbers = #tpu.dot_dimension_numbers<[1], [0], [0], [1], [0, 0, 1, 1], [], []>} : vector<4x128xf32>, vector<128x128xf32>, vector<4x128xf32> -> vector<4x128xf32>
    %c0_27 = arith.constant 0 : index
    %c0_28 = arith.constant 0 : index
    %c0_29 = arith.constant 0 : index
    %72 = vector.load %arg7[%c0_27, %c0_28, %c0_29] : memref<2x1x128xf32, #tpu.memory_space<vmem>>, vector<1x1x128xf32>
    %73 = vector.shape_cast %72 : vector<1x1x128xf32> to vector<1x128xf32>
    %74 = vector.broadcast %73 : vector<1x128xf32> to vector<4x128xf32>
    %75 = arith.addf %71, %74 : vector<4x128xf32>
    %76 = arith.addf %75, %4 : vector<4x128xf32>
    %cst_30 = arith.constant 0.000000e+00 : f32
    %77 = vector.broadcast %cst_30 : f32 to vector<4x128xf32>
    %78 = arith.maximumf %76, %77 : vector<4x128xf32>
    %c1 = arith.constant 1 : index
    %c0_31 = arith.constant 0 : index
    %c0_32 = arith.constant 0 : index
    %79 = vector.load %arg4[%c1, %c0_31, %c0_32] : memref<2x8x4xf32, #tpu.memory_space<vmem>>, vector<1x8x4xf32>
    %80 = vector.shape_cast %79 : vector<1x8x4xf32> to vector<8x4xf32>
    %cst_33 = arith.constant dense<0.000000e+00> : vector<8x128xf32>
    %81 = tpu.matmul %80, %78, %cst_33 {dimension_numbers = #tpu.dot_dimension_numbers<[1], [0], [0], [1], [0, 0, 1, 1], [], []>} : vector<8x4xf32>, vector<4x128xf32>, vector<8x128xf32> -> vector<8x128xf32>
    %c1_34 = arith.constant 1 : index
    %c0_35 = arith.constant 0 : index
    %c0_36 = arith.constant 0 : index
    %82 = vector.load %arg5[%c1_34, %c0_35, %c0_36] : memref<2x8x1xf32, #tpu.memory_space<vmem>>, vector<1x8x1xf32>
    %83 = vector.shape_cast %82 : vector<1x8x1xf32> to vector<8x1xf32>
    %84 = vector.broadcast %83 : vector<8x1xf32> to vector<8x128xf32>
    %85 = arith.addf %81, %84 : vector<8x128xf32>
    %86 = vector.extract_strided_slice %85 {offsets = [0, 0], sizes = [4, 128], strides = [1, 1]} : vector<8x128xf32> to vector<4x128xf32>
    %87 = vector.extract_strided_slice %85 {offsets = [4, 0], sizes = [1, 128], strides = [1, 1]} : vector<8x128xf32> to vector<1x128xf32>
    %88 = vector.extract_strided_slice %85 {offsets = [5, 0], sizes = [1, 128], strides = [1, 1]} : vector<8x128xf32> to vector<1x128xf32>
    %89 = tpu.transpose %88, [1, 0] : vector<1x128xf32> -> vector<128x1xf32>
    %90 = vector.broadcast %87 : vector<1x128xf32> to vector<128x128xf32>
    %91 = vector.broadcast %89 : vector<128x1xf32> to vector<128x128xf32>
    %92 = arith.addf %90, %91 : vector<128x128xf32>
    %cst_37 = arith.constant 0.000000e+00 : f32
    %93 = vector.broadcast %cst_37 : f32 to vector<128x128xf32>
    %94 = arith.cmpf ogt, %92, %93 : vector<128x128xf32>
    %cst_38 = arith.constant 0.00999999977 : f32
    %95 = vector.broadcast %cst_38 : f32 to vector<128x128xf32>
    %96 = arith.mulf %95, %92 : vector<128x128xf32>
    %97 = arith.select %94, %92, %96 : vector<128x128xi1>, vector<128x128xf32>
    %cst_39 = arith.constant -1.000000e+09 : f32
    %98 = vector.broadcast %cst_39 : f32 to vector<128x128xf32>
    %99 = arith.select %7, %97, %98 : vector<128x128xi1>, vector<128x128xf32>
    %cst_40 = arith.constant dense<0xFF800000> : vector<128xf32>
    %100 = vector.multi_reduction <maximumf>, %99, %cst_40 [0] : vector<128x128xf32> to vector<128xf32>
    %101 = vector.shape_cast %100 : vector<128xf32> to vector<1x128xf32>
    %102 = vector.broadcast %101 : vector<1x128xf32> to vector<128x128xf32>
    %103 = arith.subf %99, %102 : vector<128x128xf32>
    %104 = math.exp %103 : vector<128x128xf32>
    %cst_41 = arith.constant dense<0.000000e+00> : vector<128xf32>
    %105 = vector.multi_reduction <add>, %104, %cst_41 [0] : vector<128x128xf32> to vector<128xf32>
    %106 = vector.shape_cast %105 : vector<128xf32> to vector<1x128xf32>
    %107 = tpu.reciprocal %106 {approx = true} : vector<1x128xf32> -> vector<1x128xf32>
    %108 = vector.broadcast %107 : vector<1x128xf32> to vector<128x128xf32>
    %109 = arith.mulf %104, %108 : vector<128x128xf32>
    %cst_42 = arith.constant dense<0.000000e+00> : vector<4x128xf32>
    %110 = tpu.matmul %86, %109, %cst_42 {dimension_numbers = #tpu.dot_dimension_numbers<[1], [0], [0], [1], [0, 0, 1, 1], [], []>} : vector<4x128xf32>, vector<128x128xf32>, vector<4x128xf32> -> vector<4x128xf32>
    %cst_43 = arith.constant 0.000000e+00 : f32
    %111 = vector.broadcast %cst_43 : f32 to vector<4x128xf32>
    %112 = arith.cmpf ogt, %110, %111 : vector<4x128xf32>
    %cst_44 = arith.constant 0.000000e+00 : f32
    %113 = vector.broadcast %cst_44 : f32 to vector<4x128xf32>
    %114 = arith.minimumf %110, %113 : vector<4x128xf32>
    %115 = math.exp %114 : vector<4x128xf32>
    %cst_45 = arith.constant 1.000000e+00 : f32
    %116 = vector.broadcast %cst_45 : f32 to vector<4x128xf32>
    %117 = arith.subf %115, %116 : vector<4x128xf32>
    %118 = arith.select %112, %110, %117 : vector<4x128xi1>, vector<4x128xf32>
    %119 = vector.extract_strided_slice %118 {offsets = [0, 0], sizes = [1, 32], strides = [1, 1]} : vector<4x128xf32> to vector<1x32xf32>
    %120 = vector.extract_strided_slice %118 {offsets = [0, 32], sizes = [1, 32], strides = [1, 1]} : vector<4x128xf32> to vector<1x32xf32>
    %121 = vector.extract_strided_slice %118 {offsets = [0, 64], sizes = [1, 32], strides = [1, 1]} : vector<4x128xf32> to vector<1x32xf32>
    %122 = vector.extract_strided_slice %118 {offsets = [0, 96], sizes = [1, 32], strides = [1, 1]} : vector<4x128xf32> to vector<1x32xf32>
    %123 = tpu.concatenate %119, %120, %121, %122 in 0 : vector<1x32xf32>, vector<1x32xf32>, vector<1x32xf32>, vector<1x32xf32> -> vector<4x32xf32>
    %124 = vector.extract_strided_slice %118 {offsets = [1, 0], sizes = [1, 32], strides = [1, 1]} : vector<4x128xf32> to vector<1x32xf32>
    %125 = vector.extract_strided_slice %118 {offsets = [1, 32], sizes = [1, 32], strides = [1, 1]} : vector<4x128xf32> to vector<1x32xf32>
    %126 = vector.extract_strided_slice %118 {offsets = [1, 64], sizes = [1, 32], strides = [1, 1]} : vector<4x128xf32> to vector<1x32xf32>
    %127 = vector.extract_strided_slice %118 {offsets = [1, 96], sizes = [1, 32], strides = [1, 1]} : vector<4x128xf32> to vector<1x32xf32>
    %128 = tpu.concatenate %124, %125, %126, %127 in 0 : vector<1x32xf32>, vector<1x32xf32>, vector<1x32xf32>, vector<1x32xf32> -> vector<4x32xf32>
    %129 = vector.extract_strided_slice %118 {offsets = [2, 0], sizes = [1, 32], strides = [1, 1]} : vector<4x128xf32> to vector<1x32xf32>
    %130 = vector.extract_strided_slice %118 {offsets = [2, 32], sizes = [1, 32], strides = [1, 1]} : vector<4x128xf32> to vector<1x32xf32>
    %131 = vector.extract_strided_slice %118 {offsets = [2, 64], sizes = [1, 32], strides = [1, 1]} : vector<4x128xf32> to vector<1x32xf32>
    %132 = vector.extract_strided_slice %118 {offsets = [2, 96], sizes = [1, 32], strides = [1, 1]} : vector<4x128xf32> to vector<1x32xf32>
    %133 = tpu.concatenate %129, %130, %131, %132 in 0 : vector<1x32xf32>, vector<1x32xf32>, vector<1x32xf32>, vector<1x32xf32> -> vector<4x32xf32>
    %134 = vector.extract_strided_slice %118 {offsets = [3, 0], sizes = [1, 32], strides = [1, 1]} : vector<4x128xf32> to vector<1x32xf32>
    %135 = vector.extract_strided_slice %118 {offsets = [3, 32], sizes = [1, 32], strides = [1, 1]} : vector<4x128xf32> to vector<1x32xf32>
    %136 = vector.extract_strided_slice %118 {offsets = [3, 64], sizes = [1, 32], strides = [1, 1]} : vector<4x128xf32> to vector<1x32xf32>
    %137 = vector.extract_strided_slice %118 {offsets = [3, 96], sizes = [1, 32], strides = [1, 1]} : vector<4x128xf32> to vector<1x32xf32>
    %138 = tpu.concatenate %134, %135, %136, %137 in 0 : vector<1x32xf32>, vector<1x32xf32>, vector<1x32xf32>, vector<1x32xf32> -> vector<4x32xf32>
    %139 = tpu.concatenate %123, %128, %133, %138 in 1 : vector<4x32xf32>, vector<4x32xf32>, vector<4x32xf32>, vector<4x32xf32> -> vector<4x128xf32>
    %c1_46 = arith.constant 1 : index
    %c0_47 = arith.constant 0 : index
    %c0_48 = arith.constant 0 : index
    %140 = vector.load %arg6[%c1_46, %c0_47, %c0_48] : memref<2x128x128xf32, #tpu.memory_space<vmem>>, vector<1x128x128xf32>
    %141 = vector.shape_cast %140 : vector<1x128x128xf32> to vector<128x128xf32>
    %cst_49 = arith.constant dense<0.000000e+00> : vector<4x128xf32>
    %142 = tpu.matmul %139, %141, %cst_49 {dimension_numbers = #tpu.dot_dimension_numbers<[1], [0], [0], [1], [0, 0, 1, 1], [], []>} : vector<4x128xf32>, vector<128x128xf32>, vector<4x128xf32> -> vector<4x128xf32>
    %c1_50 = arith.constant 1 : index
    %c0_51 = arith.constant 0 : index
    %c0_52 = arith.constant 0 : index
    %143 = vector.load %arg7[%c1_50, %c0_51, %c0_52] : memref<2x1x128xf32, #tpu.memory_space<vmem>>, vector<1x1x128xf32>
    %144 = vector.shape_cast %143 : vector<1x1x128xf32> to vector<1x128xf32>
    %145 = vector.broadcast %144 : vector<1x128xf32> to vector<4x128xf32>
    %146 = arith.addf %142, %145 : vector<4x128xf32>
    %147 = arith.addf %146, %78 : vector<4x128xf32>
    %cst_53 = arith.constant 0.000000e+00 : f32
    %148 = vector.broadcast %cst_53 : f32 to vector<4x128xf32>
    %149 = arith.maximumf %147, %148 : vector<4x128xf32>
    %c0_54 = arith.constant 0 : index
    %c0_55 = arith.constant 0 : index
    %150 = vector.load %arg8[%c0_54, %c0_55] : memref<4x128xf32, #tpu.memory_space<vmem>>, vector<4x128xf32>
    tpu.vector_store %arg8[%c0_54, %c0_55], %149 {strides = array<i32>} : memref<4x128xf32, #tpu.memory_space<vmem>>, vector<4x128xf32>,
    return
  }
}

</mosaic_0001>

<bundles_post_ra>
// kernel: stgat_forward.1
= control target key start
LH: loop header
LB: loop body
LE: loop exit
PB: predicated region body
PF: predicated region fallthrough
CT: control target
= control target key end

     0   :  { %13 = vsyncpa [#allocation3], 0  ;;  %s1224_s30 = smov [#allocation2]   ;;  %s1225_s10 = smov 128   ;;  %s1803_s0 = inlined_call_operand.vmem [shape: f32[4,128], index: 0, kind: input, shape index: {}]   ;;  %s1804_s1 = inlined_call_operand.vmem [shape: f32[4,128], index: 1, kind: input, shape index: {}]   ;;  %s1805_s2 = inlined_call_operand.vmem [shape: f32[4,128], index: 2, kind: input, shape index: {}]   ;;  %s1806_s3 = inlined_call_operand.vmem [shape: f32[128,128], index: 3, kind: input, shape index: {}]   ;;  %s1807_s4 = inlined_call_operand.vmem [shape: f32[2,8,4], index: 4, kind: input, shape index: {}]   ;;  %s1808_s5 = inlined_call_operand.vmem [shape: f32[2,8,1], index: 5, kind: input, shape index: {}]   ;;  %s1809_s6 = inlined_call_operand.hbm [shape: f32[2,128,128], index: 6, kind: input, shape index: {}]   ;;  %s1810_s7 = inlined_call_operand.vmem [shape: f32[2,1,128], index: 7, kind: input, shape index: {}]   ;;  %s1811_s8 = inlined_call_operand.vmem [shape: f32[4,128], index: 8, kind: output, shape index: {}]  }
   0x1   :  { %s30_s29 = sshll.u32 %s1809_s6, 4  ;;  %s32_s9 = sshll.u32 %s1224_s30, 4  ;;  %s31_s29 = int_to_ptr.hbm [resolvable:$true] %s30_s29  ;;  %s33_s9 = int_to_ptr.vmem [resolvable:$true] %s32_s9 }
   0x2   :  { %s1226_s11 = smov 8  }
   0x3   :  { %38 = dma.hbm_to_vmem [thread:$0]  %s31_s29, 4096, %s33_s9, [#allocation3], %s1225_s10, %s1225_s10, %s1226_s11  }
   0x4   :  { %1222 = dma.done.wait [#allocation3], 4096  }
   0x5   :  { %1223 = vsyncadd [#allocation3], 4294963200  ;;  %v1227_v0 = vmov 0   ;;  %v45_v1 = vld [vmem:[%s1803_s0] sm:$0xf]  ;;  %vm93_vm0 = vcmask 1043456  }
   0x6   :  { %1071 = vset.pattern.permute.xlu0 %v1227_v0  ;;  %1072 = vset.pattern.permute.xlu1 %v1227_v0  ;;  %v46_v2 = vld [vmem:[%s1804_s1] sm:$0xf]  ;;  %vm89_vm1 = vcmask 31744   ;;  %v1313_v44 = vld [vmem:[%s1806_s3 + $0x10] sm:$0xff]  ;;  %v1323_v47 = vld [vmem:[%s1806_s3 + $0x18] sm:$0xff]  ;;  %s1229_s24 = smov 64  }
   0x7   :  { %1073 = vset.pattern.permute.xlu2 %v1227_v0  ;;  %v48_v3 = vld [vmem:[%s1805_s2] sm:$0xf]  ;;  %v47_v4 = vmul.f32 %v46_v2, %v45_v1  ;;  %v1328_v48 = vld [vmem:[%s1806_s3 + $0x8] sm:$0xff]  ;;  %vm1813_vm5 = vcmp.gt.f32.partialorder %v1313_v44, 0.0  ;;  %vm1812_vm9 = vcmp.gt.f32.partialorder %v1323_v47, 0.0  ;;  %v1354_v62 = vld [vmem:[%s1806_s3 + $0x38] sm:$0xff] }
   0x8   :  { %v83_v5 = vld [vmem:[%s1808_s5] sm:$0xff]  ;;  %v1333_v53 = vld [vmem:[%s1806_s3 + $0x28] sm:$0xff]  ;;  %vm1815_vm10 = vcmp.gt.f32.partialorder %v1328_v48, 0.0  ;;  %v1359_v63 = vld [vmem:[%s1806_s3 + $0x30] sm:$0xff]  ;;  %vm1816_vm15 = vcmp.gt.f32.partialorder %v1354_v62, 0.0  ;;  %s1230_s25 = smov 32  }
   0x9   :  { %86 = vperm.xlu0 %1071, %v83_v5   ;;  %v1291_v6 = vadd.f32 %v48_v3, %v47_v4  ;;  %v82_v7 = vld [vmem:[%s1807_s4] sm:$0xff]  ;;  %vm1814_vm11 = vcmp.gt.f32.partialorder %v1333_v53, 0.0 }
   0xa   :  { %v1318_v46 = vld [vmem:[%s1806_s3] sm:$0xff] }
   0xb   :  { %1054 = vmatpush.msk.msra.mxu0 %vm93_vm0, %v1291_v6  ;;  %v1338_v55 = vld [vmem:[%s1806_s3 + $0x20] sm:$0xff]  ;;  %vm66_vm8 = vcmp.gt.f32.partialorder %v1318_v46, 0.0 }
   0xc   :  { %1055 = vmatmul.msk.f32.vlgmr.msra.gmra.mxu0 %vm89_vm1, %v82_v7  ;;  %vm1817_vm12 = vcmp.gt.f32.partialorder %v1338_v55, 0.0  ;;  %v1369_v7 = vld [vmem:[%s1806_s3 + $0x48] sm:$0xff] }
  0x7b   :  { %v87_v8 = vpop.permute.xlu0 %86 }
  0x89   :  { %v114_v9 = vpop.f32.mrf.mxu0 }
  0x8a   :  { %v1299_v10 = vadd.f32 %v114_v9, %v87_v8 }
  0x8c   :  { %v118_v11 = vrot.slane %v1299_v10, 5  ;;  %v1303_v37 = vperm.slane %v1299_v10, 4 }
  0x8e   :  { %120 = vxpose.xlu0.b32.start.end [1/1] (short) %v118_v11, 128 }
 0x132   :  { %v136_v12 = vpop.trf.xlu0 }
 0x133   :  { %155 = vperm.xlu1 %1072, %v136_v12  }
 0x13a   :  { %v137_v13 = vpop.trf.xlu0 }
 0x13b   :  { %160 = vperm.xlu1 %1072, %v137_v13  }
 0x142   :  { %v138_v14 = vpop.trf.xlu0 }
 0x143   :  { %165 = vperm.xlu2 %1073, %v138_v14  }
 0x14a   :  { %v139_v15 = vpop.trf.xlu0 }
 0x14b   :  { %170 = vperm.xlu2 %1073, %v139_v15   ;;  %v1393_v15 = vld [vmem:[%s1806_s3 + $0x40] sm:$0xff] }
 0x152   :  { %v140_v16 = vpop.trf.xlu0 }
 0x153   :  { %175 = vperm.xlu1 %1072, %v140_v16   ;;  %v1398_v16 = vld [vmem:[%s1806_s3 + $0x58] sm:$0xff] }
 0x15a   :  { %v141_v17 = vpop.trf.xlu0 }
 0x15b   :  { %180 = vperm.xlu2 %1073, %v141_v17  }
 0x162   :  { %v142_v18 = vpop.trf.xlu0 }
 0x163   :  { %185 = vperm.xlu1 %1072, %v142_v18  }
 0x16a   :  { %v143_v19 = vpop.trf.xlu0 }
 0x16b   :  { %190 = vperm.xlu2 %1073, %v143_v19  }
 0x172   :  { %v144_v20 = vpop.trf.xlu0 }
 0x173   :  { %195 = vperm.xlu1 %1072, %v144_v20  }
 0x17a   :  { %v145_v21 = vpop.trf.xlu0 }
 0x17b   :  { %200 = vperm.xlu2 %1073, %v145_v21  }
 0x182   :  { %v146_v22 = vpop.trf.xlu0 }
 0x183   :  { %205 = vperm.xlu1 %1072, %v146_v22  }
 0x18a   :  { %v147_v23 = vpop.trf.xlu0 }
 0x18b   :  { %210 = vperm.xlu2 %1073, %v147_v23  }
 0x192   :  { %v148_v24 = vpop.trf.xlu0 }
 0x193   :  { %215 = vperm.xlu0 %1071, %v148_v24  }
 0x19a   :  { %v149_v25 = vpop.trf.xlu0 }
 0x19b   :  { %220 = vperm.xlu1 %1072, %v149_v25  }
 0x19d   :  { %v166_v29 = vpop.permute.xlu2 %165 }
 0x19e   :  { %v235_v39 = vadd.f32 %v166_v29, %v1303_v37  ;;  %v1416_v29 = vld [vmem:[%s1806_s3 + $0x50] sm:$0xff] }
 0x1a0   :  { %vm251_vm2 = vcmp.gt.f32.partialorder %v235_v39, 0.0  ;;  %v267_v45 = vmul.f32 0.01, %v235_v39 }
 0x1a2   :  { %v150_v26 = vpop.trf.xlu0  ;;  %v283_v59 = vsel %vm251_vm2, %v235_v39, %v267_v45  ;;  %vm1818_vm2 = vcmp.gt.f32.partialorder %v1359_v63, 0.0  ;;  %v1428_v39 = vld [vmem:[%s1806_s3 + $0x68] sm:$0xff]  ;;  %v1440_v45 = vld [vmem:[%s1806_s3 + $0x60] sm:$0xff] }
 0x1a3   :  { %225 = vperm.xlu2 %1073, %v150_v26   ;;  %v1363_v4 = vsel %vm1813_vm5, %v283_v59, -1e+09  ;;  %vm76_vm5 = vcmp.gt.f32.partialorder %v1416_v29, 0.0  ;;  %v1459_v59 = vld [vmem:[%s1806_s3 + $0x78] sm:$0xff] }
 0x1a5   :  { %v156_v28 = vpop.permute.xlu1 %155  ;;  %v171_v31 = vpop.permute.xlu2 %170 }
 0x1a6   :  { %v233_v40 = vadd.f32 %v156_v28, %v1303_v37  ;;  %v236_v41 = vadd.f32 %v171_v31, %v1303_v37 }
 0x1a8   :  { %vm249_vm3 = vcmp.gt.f32.partialorder %v233_v40, 0.0  ;;  %v265_v50 = vmul.f32 0.01, %v233_v40  ;;  %vm252_vm4 = vcmp.gt.f32.partialorder %v236_v41, 0.0  ;;  %v268_v51 = vmul.f32 0.01, %v236_v41 }
 0x1aa   :  { %v151_v27 = vpop.trf.xlu0  ;;  %v281_v60 = vsel %vm249_vm3, %v233_v40, %v265_v50  ;;  %v284_v61 = vsel %vm252_vm4, %v236_v41, %v268_v51  ;;  %vm75_vm3 = vcmp.gt.f32.partialorder %v1369_v7, 0.0 }
 0x1ab   :  { %230 = vperm.xlu1 %1072, %v151_v27   ;;  %v1373_v8 = vsel %vm66_vm8, %v281_v60, -1e+09  ;;  %v1377_v9 = vsel %vm1812_vm9, %v284_v61, -1e+09 }
 0x1ad   :  { %v161_v30 = vpop.permute.xlu1 %160 }
 0x1ae   :  { %v234_v42 = vadd.f32 %v161_v30, %v1303_v37 }
 0x1b0   :  { %v266_v52 = vmul.f32 0.01, %v234_v42  ;;  %vm250_vm6 = vcmp.gt.f32.partialorder %v234_v42, 0.0 }
 0x1b2   :  { %v282_v0 = vsel %vm250_vm6, %v234_v42, %v266_v52  ;;  %vm74_vm6 = vcmp.gt.f32.partialorder %v1393_v15, 0.0  ;;  %v1435_v42 = vld [vmem:[%s1806_s3 + $0x70] sm:$0xff]  ;;  %s1228_s3 = smov 96  }
 0x1b3   :  { %v1383_v12 = vsel %vm1815_vm10, %v282_v0, -1e+09 }
 0x1b5   :  { %v181_v33 = vpop.permute.xlu2 %180 }
 0x1b6   :  { %v238_v43 = vadd.f32 %v181_v33, %v1303_v37 }
 0x1b8   :  { %v270_v54 = vmul.f32 0.01, %v238_v43  ;;  %vm254_vm7 = vcmp.gt.f32.partialorder %v238_v43, 0.0 }
 0x1ba   :  { %v286_v1 = vsel %vm254_vm7, %v238_v43, %v270_v54  ;;  %vm77_vm7 = vcmp.gt.f32.partialorder %v1398_v16, 0.0 }
 0x1bb   :  { %v1387_v13 = vsel %vm1814_vm11, %v286_v1, -1e+09 }
 0x1bc   :  { %v314_v26 = vmax.f32 %v1383_v12, %v1387_v13 }
 0x1c5   :  { %v176_v32 = vpop.permute.xlu1 %175  ;;  %v191_v35 = vpop.permute.xlu2 %190 }
 0x1c6   :  { %v237_v56 = vadd.f32 %v176_v32, %v1303_v37  ;;  %v240_v57 = vadd.f32 %v191_v35, %v1303_v37 }
 0x1c8   :  { %v269_v2 = vmul.f32 0.01, %v237_v56  ;;  %v272_v3 = vmul.f32 0.01, %v240_v57  ;;  %vm253_vm13 = vcmp.gt.f32.partialorder %v237_v56, 0.0  ;;  %vm256_vm14 = vcmp.gt.f32.partialorder %v240_v57, 0.0 }
 0x1ca   :  { %v285_v17 = vsel %vm253_vm13, %v237_v56, %v269_v2  ;;  %v288_v18 = vsel %vm256_vm14, %v240_v57, %v272_v3 }
 0x1cb   :  { %v1411_v27 = vsel %vm1817_vm12, %v285_v17, -1e+09  ;;  %v1422_v32 = vsel %vm1816_vm15, %v288_v18, -1e+09  ;;  %vm79_vm15 = vcmp.gt.f32.partialorder %v1428_v39, 0.0  ;;  %vm80_vm12 = vcmp.gt.f32.partialorder %v1435_v42, 0.0 }
 0x1cc   :  { %v313_v40 = vmax.f32 %v1373_v8, %v1411_v27  ;;  %v316_v57 = vmax.f32 %v1377_v9, %v1422_v32 }
 0x1d5   :  { %v186_v34 = vpop.permute.xlu1 %185  ;;  %v201_v38 = vpop.permute.xlu2 %200 }
 0x1d6   :  { %v239_v5 = vadd.f32 %v186_v34, %v1303_v37  ;;  %v242_v14 = vadd.f32 %v201_v38, %v1303_v37 }
 0x1d8   :  { %v271_v22 = vmul.f32 0.01, %v239_v5  ;;  %vm255_vm4 = vcmp.gt.f32.partialorder %v239_v5, 0.0  ;;  %v274_v28 = vmul.f32 0.01, %v242_v14  ;;  %vm258_vm13 = vcmp.gt.f32.partialorder %v242_v14, 0.0 }
 0x1da   :  { %v287_v34 = vsel %vm255_vm4, %v239_v5, %v271_v22  ;;  %v290_v41 = vsel %vm258_vm13, %v242_v14, %v274_v28 }
 0x1db   :  { %v1444_v50 = vsel %vm1818_vm2, %v287_v34, -1e+09  ;;  %vm78_vm2 = vcmp.gt.f32.partialorder %v1440_v45, 0.0 }
 0x1dc   :  { %v315_v3 = vmax.f32 %v1363_v4, %v1444_v50 }
 0x1e5   :  { %v196_v36 = vpop.permute.xlu1 %195  ;;  %v211_v58 = vpop.permute.xlu2 %210 }
 0x1e6   :  { %v241_v19 = vadd.f32 %v196_v36, %v1303_v37  ;;  %v244_v23 = vadd.f32 %v211_v58, %v1303_v37  ;;  %v1452_v58 = vsel %vm75_vm3, %v290_v41, -1e+09 }
 0x1e7   :  { %v318_v17 = vmax.f32 %v314_v26, %v1452_v58 }
 0x1e8   :  { %vm257_vm14 = vcmp.gt.f32.partialorder %v241_v19, 0.0  ;;  %v273_v33 = vmul.f32 0.01, %v241_v19  ;;  %v276_v35 = vmul.f32 0.01, %v244_v23  ;;  %vm260_vm9 = vcmp.gt.f32.partialorder %v244_v23, 0.0 }
 0x1ea   :  { %v289_v51 = vsel %vm257_vm14, %v241_v19, %v273_v33  ;;  %v292_v52 = vsel %vm260_vm9, %v244_v23, %v276_v35  ;;  %vm1819_vm9 = vcmp.gt.f32.partialorder %v1459_v59, 0.0  ;;  %vm459_vm14 = vcmask 1040384  }
 0x1eb   :  { %v1463_v61 = vsel %vm74_vm6, %v289_v51, -1e+09  ;;  %v1470_v5 = vsel %vm77_vm7, %v292_v52, -1e+09 }
 0x1ec   :  { %v317_v18 = vmax.f32 %v313_v40, %v1463_v61 }
 0x1f5   :  { %v206_v49 = vpop.permute.xlu1 %205 }
 0x1f6   :  { %v243_v24 = vadd.f32 %v206_v49, %v1303_v37 }
 0x1f8   :  { %v275_v36 = vmul.f32 0.01, %v243_v24  ;;  %vm259_vm11 = vcmp.gt.f32.partialorder %v243_v24, 0.0 }
 0x1fa   :  { %v291_v54 = vsel %vm259_vm11, %v243_v24, %v275_v36 }
 0x1fd   :  { %v226_v20 = vpop.permute.xlu2 %225 }
 0x1fe   :  { %v247_v30 = vadd.f32 %v226_v20, %v1303_v37 }
 0x200   :  { %v279_v43 = vmul.f32 0.01, %v247_v30  ;;  %vm263_vm4 = vcmp.gt.f32.partialorder %v247_v30, 0.0 }
 0x202   :  { %v295_v0 = vsel %vm263_vm4, %v247_v30, %v279_v43  ;;  %vm461_vm4 = vcmask 1041408  }
 0x203   :  { %v1485_v19 = vsel %vm80_vm12, %v295_v0, -1e+09 }
 0x205   :  { %v216_v21 = vpop.permute.xlu0 %215 }
 0x206   :  { %v245_v31 = vadd.f32 %v216_v21, %v1303_v37  ;;  %v320_v21 = vmax.f32 %v316_v57, %v1470_v5 }
 0x208   :  { %v277_v49 = vmul.f32 0.01, %v245_v31  ;;  %vm261_vm13 = vcmp.gt.f32.partialorder %v245_v31, 0.0 }
 0x20a   :  { %v293_v1 = vsel %vm261_vm13, %v245_v31, %v277_v49  ;;  %vm463_vm13 = vcmask 1042432  }
 0x20b   :  { %v1489_v20 = vsel %vm78_vm2, %v293_v1, -1e+09 }
 0x20c   :  { %v321_v28 = vmax.f32 %v317_v18, %v1489_v20 }
 0x20d   :  { %v221_v11 = vpop.permute.xlu1 %220 }
 0x20e   :  { %v246_v25 = vadd.f32 %v221_v11, %v1303_v37  ;;  %v1474_v11 = vsel %vm76_vm5, %v291_v54, -1e+09 }
 0x20f   :  { %v319_v22 = vmax.f32 %v315_v3, %v1474_v11 }
 0x210   :  { %v278_v38 = vmul.f32 0.01, %v246_v25  ;;  %vm262_vm10 = vcmp.gt.f32.partialorder %v246_v25, 0.0 }
 0x211   :  { %v323_v26 = vmax.f32 %v319_v22, %v1485_v19 }
 0x212   :  { %v294_v56 = vsel %vm262_vm10, %v246_v25, %v278_v38 }
 0x213   :  { %v1478_v14 = vsel %vm79_vm15, %v294_v56, -1e+09 }
 0x214   :  { %v322_v23 = vmax.f32 %v318_v17, %v1478_v14 }
 0x216   :  { %v325_v31 = vmax.f32 %v321_v28, %v322_v23 }
 0x21d   :  { %v231_v60 = vpop.permute.xlu1 %230 }
 0x21e   :  { %v248_v2 = vadd.f32 %v231_v60, %v1303_v37 }
 0x220   :  { %vm264_vm10 = vcmp.gt.f32.partialorder %v248_v2, 0.0  ;;  %v280_v37 = vmul.f32 0.01, %v248_v2 }
 0x222   :  { %v296_v24 = vsel %vm264_vm10, %v248_v2, %v280_v37  ;;  %vm1822_vm10 = vcmask 261120  }
 0x223   :  { %v1496_v25 = vsel %vm1819_vm9, %v296_v24, -1e+09  ;;  %vm1820_vm9 = vcmask 785408  }
 0x224   :  { %v324_v30 = vmax.f32 %v320_v21, %v1496_v25 }
 0x226   :  { %v326_v33 = vmax.f32 %v323_v26, %v324_v30 }
 0x228   :  { %v327_v34 = vmax.f32 %v325_v31, %v326_v33 }
 0x22a   :  { %v328_v35 = vrot.slane %v327_v34, 4 }
 0x22c   :  { %v329_v36 = vmax.f32 %v327_v34, %v328_v35 }
 0x22e   :  { %v330_v38 = vrot.slane %v329_v36, 2 }
 0x230   :  { %v331_v40 = vmax.f32 %v329_v36, %v330_v38 }
 0x232   :  { %v332_v41 = vrot.slane %v331_v40, 1 }
 0x234   :  { %v1501_v43 = vmax.f32 %v331_v40, %v332_v41 }
 0x236   :  { %v334_v49 = vsub.f32 %v1373_v8, %v1501_v43  ;;  %v335_v51 = vsub.f32 %v1383_v12, %v1501_v43  ;;  %v336_v52 = vsub.f32 %v1363_v4, %v1501_v43  ;;  %v337_v54 = vsub.f32 %v1377_v9, %v1501_v43 }
 0x237   :  { %v338_v60 = vsub.f32 %v1411_v27, %v1501_v43  ;;  %v339_v1 = vsub.f32 %v1387_v13, %v1501_v43  ;;  %v340_v12 = vsub.f32 %v1444_v50, %v1501_v43  ;;  %v341_v9 = vsub.f32 %v1422_v32, %v1501_v43 }
 0x238   :  { %v350_v56 = vmul.f32 1.442695, %v334_v49  ;;  %v352_v57 = vmul.f32 1.442695, %v335_v51  ;;  %v354_v0 = vmul.f32 1.442695, %v336_v52  ;;  %v342_v17 = vsub.f32 %v1463_v61, %v1501_v43 }
 0x239   :  { %v356_v8 = vmul.f32 1.442695, %v337_v54  ;;  %v358_v4 = vmul.f32 1.442695, %v338_v60  ;;  %v360_v2 = vmul.f32 1.442695, %v339_v1  ;;  %v343_v18 = vsub.f32 %v1452_v58, %v1501_v43 }
 0x23a   :  { %1126 = vpow2.f32 %v350_v56  ;;  %v362_v13 = vmul.f32 1.442695, %v340_v12  ;;  %v364_v32 = vmul.f32 1.442695, %v341_v9  ;;  %v344_v23 = vsub.f32 %v1474_v11, %v1501_v43 }
 0x23b   :  { %1128 = vpow2.f32 %v352_v57  ;;  %v366_v61 = vmul.f32 1.442695, %v342_v17  ;;  %v345_v28 = vsub.f32 %v1470_v5, %v1501_v43  ;;  %v368_v58 = vmul.f32 1.442695, %v343_v18 }
 0x23c   :  { %1130 = vpow2.f32 %v354_v0  ;;  %v346_v33 = vsub.f32 %v1489_v20, %v1501_v43  ;;  %v370_v11 = vmul.f32 1.442695, %v344_v23  ;;  %v347_v36 = vsub.f32 %v1478_v14, %v1501_v43 }
 0x23d   :  { %1132 = vpow2.f32 %v356_v8  ;;  %v372_v38 = vmul.f32 1.442695, %v345_v28  ;;  %v348_v41 = vsub.f32 %v1485_v19, %v1501_v43  ;;  %v349_v20 = vsub.f32 %v1496_v25, %v1501_v43 }
 0x23e   :  { %1134 = vpow2.f32 %v358_v4  ;;  %v374_v49 = vmul.f32 1.442695, %v346_v33  ;;  %v376_v54 = vmul.f32 1.442695, %v347_v36 }
 0x23f   :  { %1136 = vpow2.f32 %v360_v2  ;;  %v378_v14 = vmul.f32 1.442695, %v348_v41  ;;  %v380_v1 = vmul.f32 1.442695, %v349_v20 }
 0x240   :  { %v1519_v3 = vpop.eup %1126  ;;  %1138 = vpow2.f32 %v362_v13 }
 0x241   :  { %v1521_v27 = vpop.eup %1128  ;;  %1140 = vpow2.f32 %v364_v32 }
 0x242   :  { %v382_v37 = vadd.f32 %v1521_v27, %v1519_v3  ;;  %v1527_v50 = vpop.eup %1130  ;;  %1142 = vpow2.f32 %v366_v61 }
 0x243   :  { %v1532_v22 = vpop.eup %1132  ;;  %1144 = vpow2.f32 %v368_v58 }
 0x244   :  { %v383_v21 = vadd.f32 %v1527_v50, %v382_v37  ;;  %v1537_v26 = vpop.eup %1134  ;;  %1146 = vpow2.f32 %v370_v11 }
 0x245   :  { %v1542_v31 = vpop.eup %1136  ;;  %1148 = vpow2.f32 %v372_v38 }
 0x246   :  { %v384_v24 = vadd.f32 %v1532_v22, %v383_v21  ;;  %v1139_v35 = vpop.eup %1138  ;;  %1150 = vpow2.f32 %v374_v49 }
 0x247   :  { %v1141_v40 = vpop.eup %1140  ;;  %1152 = vpow2.f32 %v376_v54 }
 0x248   :  { %v385_v30 = vadd.f32 %v1537_v26, %v384_v24  ;;  %v1143_v52 = vpop.eup %1142  ;;  %1154 = vpow2.f32 %v378_v14 }
 0x249   :  { %v1145_v57 = vpop.eup %1144  ;;  %1156 = vpow2.f32 %v380_v1 }
 0x24a   :  { %v386_v34 = vadd.f32 %v1542_v31, %v385_v30  ;;  %v1147_v0 = vpop.eup %1146 }
 0x24b   :  { %v1149_v12 = vpop.eup %1148 }
 0x24c   :  { %v387_v5 = vadd.f32 %v1139_v35, %v386_v34  ;;  %v1151_v4 = vpop.eup %1150 }
 0x24d   :  { %v1153_v2 = vpop.eup %1152 }
 0x24e   :  { %v388_v51 = vadd.f32 %v1141_v40, %v387_v5  ;;  %v1155_v25 = vpop.eup %1154 }
 0x24f   :  { %v1157_v13 = vpop.eup %1156 }
 0x250   :  { %v389_v56 = vadd.f32 %v1143_v52, %v388_v51 }
 0x252   :  { %v390_v60 = vadd.f32 %v1145_v57, %v389_v56 }
 0x254   :  { %v391_v8 = vadd.f32 %v1147_v0, %v390_v60 }
 0x256   :  { %v392_v19 = vadd.f32 %v1149_v12, %v391_v8 }
 0x258   :  { %v393_v9 = vadd.f32 %v1151_v4, %v392_v19 }
 0x25a   :  { %v394_v17 = vadd.f32 %v1153_v2, %v393_v9 }
 0x25c   :  { %v395_v43 = vadd.f32 %v1155_v25, %v394_v17 }
 0x25e   :  { %v396_v37 = vadd.f32 %v1157_v13, %v395_v43 }
 0x260   :  { %v397_v18 = vrot.slane %v396_v37, 4 }
 0x262   :  { %v398_v32 = vadd.f32 %v397_v18, %v396_v37 }
 0x264   :  { %v399_v21 = vrot.slane %v398_v32, 2 }
 0x266   :  { %v400_v23 = vadd.f32 %v399_v21, %v398_v32 }
 0x268   :  { %v401_v61 = vrot.slane %v400_v23, 1 }
 0x26a   :  { %v402_v24 = vadd.f32 %v401_v61, %v400_v23 }
 0x26c   :  { %1158 = vrcp.f32 %v402_v24 }
 0x272   :  { %v1159_v28 = vpop.eup %1158 }
 0x273   :  { %v419_v58 = vmul.f32 %v1159_v28, %v1157_v13  ;;  %v418_v30 = vmul.f32 %v1159_v28, %v1155_v25  ;;  %v417_v33 = vmul.f32 %v1159_v28, %v1153_v2  ;;  %v416_v11 = vmul.f32 %v1159_v28, %v1151_v4 }
 0x274   :  { %v415_v34 = vmul.f32 %v1159_v28, %v1149_v12  ;;  %v414_v36 = vmul.f32 %v1159_v28, %v1147_v0  ;;  %v413_v38 = vmul.f32 %v1159_v28, %v1145_v57  ;;  %v412_v5 = vmul.f32 %v1159_v28, %v1143_v52 }
 0x275   :  { %420 = vmatpush.msra.mxu1 %v419_v58  ;;  %v411_v41 = vmul.f32 %v1159_v28, %v1141_v40  ;;  %v410_v49 = vmul.f32 %v1159_v28, %v1139_v35  ;;  %v409_v51 = vmul.f32 %v1159_v28, %v1542_v31  ;;  %v408_v20 = vmul.f32 %v1159_v28, %v1537_v26 }
 0x276   :  { %v407_v54 = vmul.f32 %v1159_v28, %v1532_v22  ;;  %v406_v56 = vmul.f32 %v1159_v28, %v1527_v50  ;;  %v405_v57 = vmul.f32 %v1159_v28, %v1521_v27  ;;  %v404_v40 = vmul.f32 %v1159_v28, %v1519_v3 }
 0x277   :  { %421 = vmatpush.msra.mxu1 %v418_v30 }
 0x279   :  { %422 = vmatpush.msra.mxu1 %v417_v33  ;;  %v1058_v33 = vld [vmem:[%s1808_s5 + $0x8] sm:$0xff] }
 0x27b   :  { %423 = vmatpush.msra.mxu1 %v416_v11 }
 0x27d   :  { %424 = vmatpush.msra.mxu1 %v415_v34 }
 0x27f   :  { %425 = vmatpush.msra.mxu1 %v414_v36 }
 0x281   :  { %426 = vmatpush.msra.mxu1 %v413_v38 }
 0x283   :  { %427 = vmatpush.msra.mxu1 %v412_v5 }
 0x285   :  { %428 = vmatpush.msra.mxu1 %v411_v41  ;;  %v540_v41 = vld [vmem:[#allocation2 + $0x78] sm:$0xff] }
 0x286   :  { %545 = vmatpush.msra.mxu2 %v540_v41 }
 0x287   :  { %429 = vmatpush.msra.mxu1 %v410_v49  ;;  %v539_v49 = vld [vmem:[#allocation2 + $0x70] sm:$0xff] }
 0x288   :  { %546 = vmatpush.msra.mxu2 %v539_v49 }
 0x289   :  { %430 = vmatpush.msra.mxu1 %v409_v51  ;;  %v538_v51 = vld [vmem:[#allocation2 + $0x68] sm:$0xff] }
 0x28a   :  { %547 = vmatpush.msra.mxu2 %v538_v51 }
 0x28b   :  { %431 = vmatpush.msra.mxu1 %v408_v20  ;;  %v537_v20 = vld [vmem:[#allocation2 + $0x60] sm:$0xff] }
 0x28c   :  { %548 = vmatpush.msra.mxu2 %v537_v20 }
 0x28d   :  { %432 = vmatpush.msra.mxu1 %v407_v54  ;;  %v536_v54 = vld [vmem:[#allocation2 + $0x58] sm:$0xff] }
 0x28e   :  { %549 = vmatpush.msra.mxu2 %v536_v54 }
 0x28f   :  { %433 = vmatpush.msra.mxu1 %v406_v56  ;;  %v535_v56 = vld [vmem:[#allocation2 + $0x50] sm:$0xff] }
 0x290   :  { %550 = vmatpush.msra.mxu2 %v535_v56 }
 0x291   :  { %434 = vmatpush.msra.mxu1 %v405_v57  ;;  %v534_v57 = vld [vmem:[#allocation2 + $0x48] sm:$0xff] }
 0x292   :  { %551 = vmatpush.msra.mxu2 %v534_v57 }
 0x293   :  { %435 = vmatpush.msra.mxu1 %v404_v40  ;;  %v533_v40 = vld [vmem:[#allocation2 + $0x40] sm:$0xff] }
 0x294   :  { %436 = vmatmul.f32.vlgmr.msra.gmra.mxu1 %v1299_v10  ;;  %552 = vmatpush.msra.mxu2 %v533_v40 }
 0x311   :  { %v437_v35 = vpop.f32.mrf.mxu1 }
 0x312   :  { %v441_v31 = vmin.f32 %v437_v35, 0.0  ;;  %vm440_vm11 = vcmp.gt.f32.partialorder %v437_v35, 0.0 }
 0x314   :  { %v442_v52 = vmul.f32 1.442695, %v441_v31  ;;  %v531_v31 = vld [vmem:[#allocation2 + $0x30] sm:$0xff] }
 0x316   :  { %1160 = vpow2.f32 %v442_v52  ;;  %v530_v52 = vld [vmem:[#allocation2 + $0x28] sm:$0xff] }
 0x31c   :  { %v1161_v26 = vpop.eup %1160 }
 0x31d   :  { %v1056_v14 = vadd.f32 -1.0, %v1161_v26  ;;  %v529_v26 = vld [vmem:[#allocation2 + $0x20] sm:$0xff] }
 0x31f   :  { %v1560_v22 = vsel %vm440_vm11, %v437_v35, %v1056_v14  ;;  %v532_v35 = vld [vmem:[#allocation2 + $0x38] sm:$0xff]  ;;  %vm1821_vm11 = vcmask 523264  }
 0x320   :  { %v465_v50 = vrot.slane %v1560_v22, 1  ;;  %v447_v60 = vrot.slane %v1560_v22, 7  ;;  %v451_v10 = vrot.slane %v1560_v22, 6  ;;  %v479_v1 = vrot.slane %v1560_v22, 2  ;;  %553 = vmatpush.msra.mxu2 %v532_v35  ;;  %v528_v14 = vld [vmem:[#allocation2 + $0x18] sm:$0xff] }
 0x321   :  { %v455_v21 = vrot.slane %v1560_v22, 5  ;;  %v493_v30 = vrot.slane %v1560_v22, 3 }
 0x322   :  { %v1074_v27 = vpack.i.bf16 %v465_v50, %v1560_v22  ;;  %v1079_v3 = vpack.i.bf16 %v1560_v22, %v447_v60  ;;  %v1084_v0 = vpack.i.bf16 %v447_v60, %v451_v10  ;;  %554 = vmatpush.msra.mxu2 %v531_v31 }
 0x324   :  { %1075 = vrot.lane.b32.xlu2 %v1074_v27, %s1228_s3  ;;  %1080 = vrot.lane.b32.xlu1 %v1079_v3, %s1229_s24  ;;  %v525_v27 = vld [vmem:[#allocation2] sm:$0xff] }
 0x325   :  { %555 = vmatpush.msra.mxu2 %v530_v52 }
 0x327   :  { %556 = vmatpush.msra.mxu2 %v529_v26 }
 0x329   :  { %557 = vmatpush.msra.mxu2 %v528_v14 }
 0x32c   :  { %1085 = vrot.lane.b32.xlu2 %v1084_v0, %s1230_s25  ;;  %495 = vrot.lane.b32.xlu1 %v479_v1, %s1228_s3 }
 0x334   :  { %498 = vrot.lane.b32.xlu2 %v465_v50, %s1229_s24  ;;  %501 = vrot.lane.b32.xlu1 %v1560_v22, %s1230_s25 }
 0x33c   :  { %448 = vrot.lane.b32.xlu2 %v447_v60, %s1228_s3  ;;  %v526_v60 = vld [vmem:[#allocation2 + $0x8] sm:$0xff] }
 0x37e   :  { %v1076_v8 = vpop.permute.xlu2 %1075 }
 0x37f   :  { %v1078_v12 = vunpack.i.h.bf16 %v1076_v8  ;;  %v1077_v19 = vunpack.i.l.bf16 %v1076_v8 }
 0x381   :  { %v490_v25 = vsel %vm459_vm14, %v479_v1, %v1078_v12  ;;  %v476_v43 = vsel %vm459_vm14, %v465_v50, %v1077_v19  ;;  %v527_v50 = vld [vmem:[#allocation2 + $0x10] sm:$0xff] }
 0x382   :  { %558 = vmatpush.msra.mxu2 %v527_v50 }
 0x384   :  { %559 = vmatpush.msra.mxu2 %v526_v60 }
 0x386   :  { %v1086_v4 = vpop.permute.xlu2 %1085  ;;  %560 = vmatpush.msra.mxu2 %v525_v27 }
 0x387   :  { %v1088_v13 = vunpack.i.h.bf16 %v1086_v4  ;;  %v1087_v37 = vunpack.i.l.bf16 %v1086_v4 }
 0x38e   :  { %v499_v34 = vpop.permute.xlu2 %498 }
 0x396   :  { %v1081_v9 = vpop.permute.xlu1 %1080  ;;  %v449_v3 = vpop.permute.xlu2 %448 }
 0x397   :  { %v1083_v2 = vunpack.i.h.bf16 %v1081_v9  ;;  %v1082_v17 = vunpack.i.l.bf16 %v1081_v9  ;;  %v460_v8 = vsel %vm459_vm14, %v1560_v22, %v449_v3  ;;  %v1124_v22 = vld [vmem:[%s1810_s7] ss:$0 sm:$0xff] }
 0x399   :  { %v491_v18 = vsel %vm461_vm4, %v490_v25, %v1083_v2  ;;  %v477_v32 = vsel %vm461_vm4, %v476_v43, %v1082_v17 }
 0x39a   :  { %v492_v23 = vsel %vm463_vm13, %v491_v18, %v1088_v13  ;;  %v478_v61 = vsel %vm463_vm13, %v477_v32, %v1087_v37 }
 0x39b   :  { %v1094_v24 = vpack.i.bf16 %v492_v23, %v451_v10  ;;  %v1089_v28 = vpack.i.bf16 %v478_v61, %v455_v21  ;;  %v1057_v23 = vld [vmem:[%s1807_s4 + $0x8] sm:$0xff] }
 0x39d   :  { %1095 = vrot.lane.b32.xlu1 %v1094_v24, %s1229_s24  ;;  %1090 = vrot.lane.b32.xlu2 %v1089_v28, %s1230_s25 }
 0x39e   :  { %v496_v58 = vpop.permute.xlu1 %495 }
 0x39f   :  { %v504_v11 = vsel %vm459_vm14, %v493_v30, %v496_v58 }
 0x3a0   :  { %v505_v38 = vsel %vm461_vm4, %v504_v11, %v499_v34 }
 0x3a5   :  { %573 = vperm.xlu2 %1073, %v1058_v33  }
 0x3a6   :  { %v502_v36 = vpop.permute.xlu1 %501 }
 0x3a7   :  { %v506_v5 = vsel %vm463_vm13, %v505_v38, %v502_v36 }
 0x3a8   :  { %516 = vrot.lane.b32.xlu1 %v506_v5, %s1228_s3 }
 0x3f7   :  { %v1091_v10 = vpop.permute.xlu2 %1090 }
 0x3f8   :  { %v1092_v12 = vunpack.i.l.bf16 %v1091_v10  ;;  %v1093_v9 = vunpack.i.h.bf16 %v1091_v10 }
 0x3ff   :  { %v574_v61 = vpop.permute.xlu2 %573 }
 0x40f   :  { %v1096_v0 = vpop.permute.xlu1 %1095 }
 0x410   :  { %v1097_v1 = vunpack.i.l.bf16 %v1096_v0  ;;  %v1098_v17 = vunpack.i.h.bf16 %v1096_v0 }
 0x412   :  { %v462_v19 = vsel %vm461_vm4, %v460_v8, %v1097_v1 }
 0x413   :  { %v464_v4 = vsel %vm463_vm13, %v462_v19, %v1092_v12 }
 0x414   :  { %v520_v2 = vsel %vm1822_vm10, %v464_v4, %v1093_v9  ;;  %vm1828_vm10 = vcmp.gt.f32.partialorder %v1313_v44, 0.0 }
 0x415   :  { %v522_v43 = vsel %vm1821_vm11, %v520_v2, %v1098_v17 }
 0x41a   :  { %v517_v25 = vpop.permute.xlu1 %516 }
 0x41b   :  { %v524_v13 = vsel %vm1820_vm9, %v522_v43, %v517_v25  ;;  %vm1823_vm9 = vcmp.gt.f32.partialorder %v1338_v55, 0.0 }
 0x41c   :  { %561 = vmatmul.f32.vlgmr.msra.gmra.mxu2 %v524_v13 }
 0x49f   :  { %v562_v37 = vpop.f32.mrf.mxu2 }
 0x4a0   :  { %v563_v18 = vadd.f32 %v1124_v22, %v562_v37 }
 0x4a2   :  { %v1604_v32 = vadd.f32 %v563_v18, %v1291_v6 }
 0x4a4   :  { %v566_v21 = vmax.f32 %v1604_v32, 0.0 }
 0x4a6   :  { %1059 = vmatpush.msk.msra.mxu3 %vm93_vm0, %v566_v21 }
 0x4a7   :  { %1060 = vmatmul.msk.f32.vlgmr.msra.gmra.mxu3 %vm89_vm1, %v1057_v23 }
 0x52a   :  { %v599_v24 = vpop.f32.mrf.mxu3 }
 0x52b   :  { %v1614_v28 = vadd.f32 %v599_v24, %v574_v61 }
 0x52d   :  { %v603_v58 = vrot.slane %v1614_v28, 5  ;;  %v1620_v26 = vperm.slane %v1614_v28, 4 }
 0x52f   :  { %605 = vxpose.xlu1.b32.start.end [1/1] (short) %v603_v58, 128 }
 0x5d3   :  { %v621_v6 = vpop.trf.xlu1 }
 0x5d4   :  { %640 = vperm.xlu2 %1073, %v621_v6  }
 0x5db   :  { %v622_v30 = vpop.trf.xlu1 }
 0x5dc   :  { %645 = vperm.xlu2 %1073, %v622_v30  }
 0x5e3   :  { %v623_v33 = vpop.trf.xlu1 }
 0x5e4   :  { %650 = vperm.xlu2 %1073, %v623_v33  }
 0x5eb   :  { %v624_v11 = vpop.trf.xlu1 }
 0x5ec   :  { %655 = vperm.xlu2 %1073, %v624_v11  }
 0x5f3   :  { %v625_v34 = vpop.trf.xlu1 }
 0x5f4   :  { %660 = vperm.xlu2 %1073, %v625_v34  }
 0x5fb   :  { %v626_v36 = vpop.trf.xlu1 }
 0x5fc   :  { %665 = vperm.xlu2 %1073, %v626_v36  }
 0x603   :  { %v627_v38 = vpop.trf.xlu1 }
 0x604   :  { %670 = vperm.xlu2 %1073, %v627_v38  }
 0x60b   :  { %v628_v5 = vpop.trf.xlu1 }
 0x60c   :  { %675 = vperm.xlu1 %1072, %v628_v5  }
 0x613   :  { %v629_v41 = vpop.trf.xlu1 }
 0x614   :  { %680 = vperm.xlu2 %1073, %v629_v41  }
 0x61b   :  { %v630_v49 = vpop.trf.xlu1 }
 0x61c   :  { %685 = vperm.xlu2 %1073, %v630_v49  }
 0x623   :  { %v631_v51 = vpop.trf.xlu1 }
 0x624   :  { %690 = vperm.xlu2 %1073, %v631_v51  }
 0x62b   :  { %v632_v20 = vpop.trf.xlu1 }
 0x62c   :  { %695 = vperm.xlu2 %1073, %v632_v20  }
 0x62e   :  { %v641_v54 = vpop.permute.xlu2 %640 }
 0x62f   :  { %v718_v14 = vadd.f32 %v641_v54, %v1620_v26 }
 0x631   :  { %v750_v60 = vmul.f32 0.01, %v718_v14  ;;  %vm734_vm0 = vcmp.gt.f32.partialorder %v718_v14, 0.0 }
 0x633   :  { %v633_v56 = vpop.trf.xlu1  ;;  %v766_v10 = vsel %vm734_vm0, %v718_v14, %v750_v60 }
 0x634   :  { %700 = vperm.xlu2 %1073, %v633_v56   ;;  %v1627_v12 = vsel %vm66_vm8, %v766_v10, -1e+09  ;;  %vm1825_vm8 = vcmp.gt.f32.partialorder %v1333_v53, 0.0 }
 0x636   :  { %v646_v57 = vpop.permute.xlu2 %645 }
 0x637   :  { %v719_v0 = vadd.f32 %v646_v57, %v1620_v26 }
 0x639   :  { %v751_v4 = vmul.f32 0.01, %v719_v0  ;;  %vm735_vm11 = vcmp.gt.f32.partialorder %v719_v0, 0.0 }
 0x63b   :  { %v634_v40 = vpop.trf.xlu1  ;;  %v767_v25 = vsel %vm735_vm11, %v719_v0, %v751_v4 }
 0x63c   :  { %705 = vperm.xlu2 %1073, %v634_v40  }
 0x63e   :  { %v1617_v35 = vpop.permute.xlu2 %650 }
 0x63f   :  { %v720_v7 = vadd.f32 %v1617_v35, %v1620_v26 }
 0x643   :  { %v635_v31 = vpop.trf.xlu1 }
 0x644   :  { %710 = vperm.xlu2 %1073, %v635_v31  }
 0x646   :  { %v656_v52 = vpop.permute.xlu2 %655 }
 0x64b   :  { %v636_v50 = vpop.trf.xlu1 }
 0x64c   :  { %715 = vperm.xlu2 %1073, %v636_v50   ;;  %v721_v50 = vadd.f32 %v656_v52, %v1620_v26  ;;  %v752_v52 = vmul.f32 0.01, %v720_v7 }
 0x64e   :  { %v661_v27 = vpop.permute.xlu2 %660  ;;  %v753_v39 = vmul.f32 0.01, %v721_v50 }
 0x64f   :  { %v722_v3 = vadd.f32 %v661_v27, %v1620_v26 }
 0x651   :  { %vm738_vm1 = vcmp.gt.f32.partialorder %v722_v3, 0.0  ;;  %v754_v1 = vmul.f32 0.01, %v722_v3 }
 0x653   :  { %v770_v8 = vsel %vm738_vm1, %v722_v3, %v754_v1  ;;  %vm1824_vm1 = vcmp.gt.f32.partialorder %v1328_v48, 0.0 }
 0x654   :  { %v1631_v19 = vsel %vm1823_vm9, %v770_v8, -1e+09  ;;  %v1638_v46 = vsel %vm1824_vm1, %v767_v25, -1e+09 }
 0x655   :  { %v798_v9 = vmax.f32 %v1627_v12, %v1631_v19 }
 0x656   :  { %v666_v2 = vpop.permute.xlu2 %665 }
 0x657   :  { %v723_v17 = vadd.f32 %v666_v2, %v1620_v26 }
 0x659   :  { %vm739_vm0 = vcmp.gt.f32.partialorder %v723_v17, 0.0  ;;  %v755_v43 = vmul.f32 0.01, %v723_v17 }
 0x65b   :  { %v771_v13 = vsel %vm739_vm0, %v723_v17, %v755_v43 }
 0x65c   :  { %v1642_v55 = vsel %vm1825_vm8, %v771_v13, -1e+09 }
 0x65d   :  { %v799_v22 = vmax.f32 %v1638_v46, %v1642_v55 }
 0x65e   :  { %v671_v37 = vpop.permute.xlu2 %670 }
 0x65f   :  { %v724_v56 = vadd.f32 %v671_v37, %v1620_v26 }
 0x661   :  { %v756_v1 = vmul.f32 0.01, %v724_v56 }
 0x66e   :  { %v681_v18 = vpop.permute.xlu2 %680 }
 0x66f   :  { %v726_v58 = vadd.f32 %v681_v18, %v1620_v26 }
 0x671   :  { %v758_v33 = vmul.f32 0.01, %v726_v58  ;;  %vm742_vm9 = vcmp.gt.f32.partialorder %v726_v58, 0.0 }
 0x673   :  { %v774_v34 = vsel %vm742_vm9, %v726_v58, %v758_v33 }
 0x674   :  { %v1652_v49 = vsel %vm74_vm6, %v774_v34, -1e+09 }
 0x675   :  { %v802_v40 = vmax.f32 %v798_v9, %v1652_v49 }
 0x676   :  { %v686_v23 = vpop.permute.xlu2 %685 }
 0x677   :  { %v727_v6 = vadd.f32 %v686_v23, %v1620_v26 }
 0x679   :  { %v759_v11 = vmul.f32 0.01, %v727_v6  ;;  %vm743_vm11 = vcmp.gt.f32.partialorder %v727_v6, 0.0 }
 0x67b   :  { %v775_v36 = vsel %vm743_vm11, %v727_v6, %v759_v11 }
 0x67c   :  { %v1656_v51 = vsel %vm75_vm3, %v775_v36, -1e+09  ;;  %vm740_vm3 = vcmp.gt.f32.partialorder %v724_v56, 0.0 }
 0x67d   :  { %v803_v31 = vmax.f32 %v799_v22, %v1656_v51  ;;  %v772_v17 = vsel %vm740_vm3, %v724_v56, %v756_v1  ;;  %vm1829_vm3 = vcmp.gt.f32.partialorder %v1323_v47, 0.0 }
 0x67e   :  { %v691_v61 = vpop.permute.xlu2 %690  ;;  %v676_v20 = vpop.permute.xlu1 %675 }
 0x67f   :  { %v725_v15 = vadd.f32 %v676_v20, %v1620_v26  ;;  %v728_v45 = vadd.f32 %v691_v61, %v1620_v26 }
 0x681   :  { %v757_v8 = vmul.f32 0.01, %v725_v15  ;;  %vm741_vm6 = vcmp.gt.f32.partialorder %v725_v15, 0.0  ;;  %v760_v9 = vmul.f32 0.01, %v728_v45  ;;  %vm744_vm8 = vcmp.gt.f32.partialorder %v728_v45, 0.0 }
 0x683   :  { %v773_v25 = vsel %vm741_vm6, %v725_v15, %v757_v8  ;;  %v776_v37 = vsel %vm744_vm8, %v728_v45, %v760_v9  ;;  %vm1833_vm6 = vcmask 785408  }
 0x684   :  { %v1689_v33 = vsel %vm76_vm5, %v776_v37, -1e+09  ;;  %vm1830_vm5 = vcmp.gt.f32.partialorder %v1459_v59, 0.0 }
 0x686   :  { %v696_v24 = vpop.permute.xlu2 %695 }
 0x687   :  { %v729_v27 = vadd.f32 %v696_v24, %v1620_v26 }
 0x689   :  { %v761_v2 = vmul.f32 0.01, %v729_v27  ;;  %vm745_vm9 = vcmp.gt.f32.partialorder %v729_v27, 0.0 }
 0x68b   :  { %v777_v18 = vsel %vm745_vm9, %v729_v27, %v761_v2 }
 0x68e   :  { %v701_v30 = vpop.permute.xlu2 %700 }
 0x68f   :  { %v730_v48 = vadd.f32 %v701_v30, %v1620_v26 }
 0x691   :  { %v762_v53 = vmul.f32 0.01, %v730_v48  ;;  %vm746_vm0 = vcmp.gt.f32.partialorder %v730_v48, 0.0 }
 0x693   :  { %v778_v5 = vsel %vm746_vm0, %v730_v48, %v762_v53  ;;  %vm1826_vm0 = vcmp.gt.f32.partialorder %v1359_v63, 0.0  ;;  %v1693_v63 = vsel %vm77_vm7, %v777_v18, -1e+09  ;;  %vm1831_vm7 = vcmask 261120  }
 0x694   :  { %v1661_v57 = vsel %vm78_vm2, %v778_v5, -1e+09  ;;  %vm736_vm2 = vcmp.gt.f32.partialorder %v720_v7, 0.0  ;;  %v788_v23 = vsel %vm1826_vm0, %v772_v17, -1e+09 }
 0x695   :  { %v806_v3 = vmax.f32 %v802_v40, %v1661_v57  ;;  %v768_v13 = vsel %vm736_vm2, %v720_v7, %v752_v52 }
 0x696   :  { %v706_v38 = vpop.permute.xlu2 %705  ;;  %v784_v58 = vsel %vm1828_vm10, %v768_v13, -1e+09  ;;  %vm1832_vm10 = vcmask 523264  }
 0x697   :  { %v731_v41 = vadd.f32 %v706_v38, %v1620_v26 }
 0x699   :  { %vm747_vm1 = vcmp.gt.f32.partialorder %v731_v41, 0.0  ;;  %v763_v54 = vmul.f32 0.01, %v731_v41 }
 0x69b   :  { %v779_v14 = vsel %vm747_vm1, %v731_v41, %v763_v54  ;;  %vm1827_vm1 = vcmp.gt.f32.partialorder %v1354_v62, 0.0  ;;  %v800_v62 = vmax.f32 %v784_v58, %v788_v23 }
 0x69c   :  { %v1671_v60 = vsel %vm79_vm15, %v779_v14, -1e+09  ;;  %vm737_vm15 = vcmp.gt.f32.partialorder %v721_v50, 0.0  ;;  %v789_v61 = vsel %vm1827_vm1, %v773_v25, -1e+09 }
 0x69d   :  { %v807_v10 = vmax.f32 %v803_v31, %v1671_v60  ;;  %v769_v22 = vsel %vm737_vm15, %v721_v50, %v753_v39 }
 0x69e   :  { %v711_v0 = vpop.permute.xlu2 %710  ;;  %v785_v48 = vsel %vm1829_vm3, %v769_v22, -1e+09 }
 0x69f   :  { %v810_v4 = vmax.f32 %v806_v3, %v807_v10  ;;  %v732_v35 = vadd.f32 %v711_v0, %v1620_v26  ;;  %v801_v11 = vmax.f32 %v785_v48, %v789_v61 }
 0x6a1   :  { %v764_v43 = vmul.f32 0.01, %v732_v35  ;;  %vm748_vm11 = vcmp.gt.f32.partialorder %v732_v35, 0.0  ;;  %v805_v47 = vmax.f32 %v801_v11, %v1693_v63 }
 0x6a3   :  { %v780_v6 = vsel %vm748_vm11, %v732_v35, %v764_v43 }
 0x6a4   :  { %v1697_v44 = vsel %vm80_vm12, %v780_v6, -1e+09 }
 0x6a6   :  { %v716_v24 = vpop.permute.xlu2 %715 }
 0x6a7   :  { %v733_v30 = vadd.f32 %v716_v24, %v1620_v26  ;;  %v804_v26 = vmax.f32 %v800_v62, %v1689_v33 }
 0x6a9   :  { %vm749_vm2 = vcmp.gt.f32.partialorder %v733_v30, 0.0  ;;  %v765_v53 = vmul.f32 0.01, %v733_v30  ;;  %v808_v16 = vmax.f32 %v804_v26, %v1697_v44 }
 0x6ab   :  { %v781_v34 = vsel %vm749_vm2, %v733_v30, %v765_v53 }
 0x6ac   :  { %v1703_v29 = vsel %vm1830_vm5, %v781_v34, -1e+09 }
 0x6ad   :  { %v809_v36 = vmax.f32 %v805_v47, %v1703_v29 }
 0x6af   :  { %v811_v38 = vmax.f32 %v808_v16, %v809_v36 }
 0x6b1   :  { %v812_v5 = vmax.f32 %v810_v4, %v811_v38 }
 0x6b3   :  { %v813_v41 = vrot.slane %v812_v5, 4 }
 0x6b5   :  { %v814_v20 = vmax.f32 %v812_v5, %v813_v41 }
 0x6b7   :  { %v815_v42 = vrot.slane %v814_v20, 2 }
 0x6b9   :  { %v816_v54 = vmax.f32 %v814_v20, %v815_v42 }
 0x6bb   :  { %v817_v56 = vrot.slane %v816_v54, 1 }
 0x6bd   :  { %v1707_v40 = vmax.f32 %v816_v54, %v817_v56 }
 0x6bf   :  { %v819_v31 = vsub.f32 %v1627_v12, %v1707_v40  ;;  %v820_v59 = vsub.f32 %v1638_v46, %v1707_v40  ;;  %v821_v15 = vsub.f32 %v784_v58, %v1707_v40  ;;  %v822_v14 = vsub.f32 %v785_v48, %v1707_v40 }
 0x6c0   :  { %v823_v7 = vsub.f32 %v1631_v19, %v1707_v40  ;;  %v824_v50 = vsub.f32 %v1642_v55, %v1707_v40  ;;  %v825_v12 = vsub.f32 %v788_v23, %v1707_v40  ;;  %v826_v0 = vsub.f32 %v789_v61, %v1707_v40 }
 0x6c1   :  { %v835_v45 = vmul.f32 1.442695, %v819_v31  ;;  %v837_v27 = vmul.f32 1.442695, %v820_v59  ;;  %v839_v3 = vmul.f32 1.442695, %v821_v15  ;;  %v827_v55 = vsub.f32 %v1652_v49, %v1707_v40 }
 0x6c2   :  { %v841_v10 = vmul.f32 1.442695, %v822_v14  ;;  %v843_v46 = vmul.f32 1.442695, %v823_v7  ;;  %v845_v1 = vmul.f32 1.442695, %v824_v50  ;;  %v828_v39 = vsub.f32 %v1656_v51, %v1707_v40 }
 0x6c3   :  { %1162 = vpow2.f32 %v835_v45  ;;  %v847_v4 = vmul.f32 1.442695, %v825_v12  ;;  %v849_v9 = vmul.f32 1.442695, %v826_v0  ;;  %v829_v25 = vsub.f32 %v1689_v33, %v1707_v40 }
 0x6c4   :  { %1164 = vpow2.f32 %v837_v27  ;;  %v851_v49 = vmul.f32 1.442695, %v827_v55  ;;  %v830_v22 = vsub.f32 %v1693_v63, %v1707_v40  ;;  %v853_v51 = vmul.f32 1.442695, %v828_v39 }
 0x6c5   :  { %1166 = vpow2.f32 %v839_v3  ;;  %v831_v23 = vsub.f32 %v1661_v57, %v1707_v40  ;;  %v855_v61 = vmul.f32 1.442695, %v829_v25  ;;  %v832_v6 = vsub.f32 %v1671_v60, %v1707_v40 }
 0x6c6   :  { %1168 = vpow2.f32 %v841_v10  ;;  %v857_v30 = vmul.f32 1.442695, %v830_v22  ;;  %v833_v63 = vsub.f32 %v1697_v44, %v1707_v40  ;;  %v834_v57 = vsub.f32 %v1703_v29, %v1707_v40 }
 0x6c7   :  { %1170 = vpow2.f32 %v843_v46  ;;  %v859_v62 = vmul.f32 1.442695, %v831_v23  ;;  %v861_v26 = vmul.f32 1.442695, %v832_v6 }
 0x6c8   :  { %1172 = vpow2.f32 %v845_v1  ;;  %v863_v60 = vmul.f32 1.442695, %v833_v63  ;;  %v865_v38 = vmul.f32 1.442695, %v834_v57 }
 0x6c9   :  { %v1721_v8 = vpop.eup %1162  ;;  %1174 = vpow2.f32 %v847_v4 }
 0x6ca   :  { %v1723_v19 = vpop.eup %1164  ;;  %1176 = vpow2.f32 %v849_v9 }
 0x6cb   :  { %v867_v35 = vadd.f32 %v1723_v19, %v1721_v8  ;;  %v1729_v52 = vpop.eup %1166  ;;  %1178 = vpow2.f32 %v851_v49 }
 0x6cc   :  { %v1734_v17 = vpop.eup %1168  ;;  %1180 = vpow2.f32 %v853_v51 }
 0x6cd   :  { %v868_v2 = vadd.f32 %v1729_v52, %v867_v35  ;;  %v1739_v13 = vpop.eup %1170  ;;  %1182 = vpow2.f32 %v855_v61 }
 0x6ce   :  { %v1173_v18 = vpop.eup %1172  ;;  %1184 = vpow2.f32 %v857_v30 }
 0x6cf   :  { %v869_v43 = vadd.f32 %v1734_v17, %v868_v2  ;;  %v1175_v58 = vpop.eup %1174  ;;  %1186 = vpow2.f32 %v859_v62 }
 0x6d0   :  { %v1177_v33 = vpop.eup %1176  ;;  %1188 = vpow2.f32 %v861_v26 }
 0x6d1   :  { %v870_v37 = vadd.f32 %v1739_v13, %v869_v43  ;;  %v1179_v53 = vpop.eup %1178  ;;  %1190 = vpow2.f32 %v863_v60 }
 0x6d2   :  { %v1181_v34 = vpop.eup %1180  ;;  %1192 = vpow2.f32 %v865_v38 }
 0x6d3   :  { %v871_v24 = vadd.f32 %v1173_v18, %v870_v37  ;;  %v1183_v36 = vpop.eup %1182 }
 0x6d4   :  { %v1185_v41 = vpop.eup %1184 }
 0x6d5   :  { %v872_v48 = vadd.f32 %v1175_v58, %v871_v24  ;;  %v1187_v20 = vpop.eup %1186 }
 0x6d6   :  { %v1189_v54 = vpop.eup %1188 }
 0x6d7   :  { %v873_v11 = vadd.f32 %v1177_v33, %v872_v48  ;;  %v1191_v29 = vpop.eup %1190 }
 0x6d8   :  { %v1193_v31 = vpop.eup %1192 }
 0x6d9   :  { %v874_v47 = vadd.f32 %v1179_v53, %v873_v11 }
 0x6db   :  { %v875_v16 = vadd.f32 %v1181_v34, %v874_v47 }
 0x6dd   :  { %v876_v5 = vadd.f32 %v1183_v36, %v875_v16 }
 0x6df   :  { %v877_v44 = vadd.f32 %v1185_v41, %v876_v5 }
 0x6e1   :  { %v878_v42 = vadd.f32 %v1187_v20, %v877_v44 }
 0x6e3   :  { %v879_v56 = vadd.f32 %v1189_v54, %v878_v42 }
 0x6e5   :  { %v880_v40 = vadd.f32 %v1191_v29, %v879_v56 }
 0x6e7   :  { %v881_v59 = vadd.f32 %v1193_v31, %v880_v40 }
 0x6e9   :  { %v882_v15 = vrot.slane %v881_v59, 4 }
 0x6eb   :  { %v883_v14 = vadd.f32 %v882_v15, %v881_v59  ;;  %v1019_v15 = vld [vmem:[#allocation2 + $0xf0] sm:$0xff] }
 0x6ed   :  { %v884_v7 = vrot.slane %v883_v14, 2 }
 0x6ef   :  { %v885_v50 = vadd.f32 %v884_v7, %v883_v14  ;;  %v1018_v14 = vld [vmem:[#allocation2 + $0xe8] sm:$0xff]  ;;  %v1017_v7 = vld [vmem:[#allocation2 + $0xe0] sm:$0xff] }
 0x6f1   :  { %v886_v45 = vrot.slane %v885_v50, 1 }
 0x6f3   :  { %v887_v27 = vadd.f32 %v886_v45, %v885_v50  ;;  %v1016_v50 = vld [vmem:[#allocation2 + $0xd8] sm:$0xff]  ;;  %v1015_v45 = vld [vmem:[#allocation2 + $0xd0] sm:$0xff] }
 0x6f5   :  { %1194 = vrcp.f32 %v887_v27  ;;  %v1014_v27 = vld [vmem:[#allocation2 + $0xc8] sm:$0xff] }
 0x6fb   :  { %v1195_v3 = vpop.eup %1194 }
 0x6fc   :  { %v904_v10 = vmul.f32 %v1195_v3, %v1193_v31  ;;  %v903_v12 = vmul.f32 %v1195_v3, %v1191_v29  ;;  %v902_v46 = vmul.f32 %v1195_v3, %v1189_v54  ;;  %v901_v0 = vmul.f32 %v1195_v3, %v1187_v20 }
 0x6fd   :  { %v900_v1 = vmul.f32 %v1195_v3, %v1185_v41  ;;  %v899_v55 = vmul.f32 %v1195_v3, %v1183_v36  ;;  %v898_v4 = vmul.f32 %v1195_v3, %v1181_v34  ;;  %v897_v35 = vmul.f32 %v1195_v3, %v1179_v53 }
 0x6fe   :  { %905 = vmatpush.msrb.mxu0 %v904_v10  ;;  %v896_v39 = vmul.f32 %v1195_v3, %v1177_v33  ;;  %v895_v9 = vmul.f32 %v1195_v3, %v1175_v58  ;;  %v894_v2 = vmul.f32 %v1195_v3, %v1173_v18  ;;  %v893_v25 = vmul.f32 %v1195_v3, %v1739_v13  ;;  %v1020_v33 = vld [vmem:[#allocation2 + $0xf8] sm:$0xff] }
 0x6ff   :  { %v892_v49 = vmul.f32 %v1195_v3, %v1734_v17  ;;  %v891_v43 = vmul.f32 %v1195_v3, %v1729_v52  ;;  %v890_v22 = vmul.f32 %v1195_v3, %v1723_v19  ;;  %v889_v51 = vmul.f32 %v1195_v3, %v1721_v8  ;;  %1026 = vmatpush.msrb.mxu3 %v1020_v33  ;;  %v1013_v3 = vld [vmem:[#allocation2 + $0xc0] sm:$0xff]  ;;  %v1012_v10 = vld [vmem:[#allocation2 + $0xb8] sm:$0xff] }
 0x700   :  { %906 = vmatpush.msrb.mxu0 %v903_v12  ;;  %v1011_v12 = vld [vmem:[#allocation2 + $0xb0] sm:$0xff] }
 0x701   :  { %1027 = vmatpush.msrb.mxu3 %v1019_v15 }
 0x702   :  { %907 = vmatpush.msrb.mxu0 %v902_v46  ;;  %v1010_v46 = vld [vmem:[#allocation2 + $0xa8] sm:$0xff] }
 0x703   :  { %1028 = vmatpush.msrb.mxu3 %v1018_v14 }
 0x704   :  { %908 = vmatpush.msrb.mxu0 %v901_v0  ;;  %v1009_v0 = vld [vmem:[#allocation2 + $0xa0] sm:$0xff] }
 0x705   :  { %1029 = vmatpush.msrb.mxu3 %v1017_v7 }
 0x706   :  { %909 = vmatpush.msrb.mxu0 %v900_v1  ;;  %v1008_v1 = vld [vmem:[#allocation2 + $0x98] sm:$0xff] }
 0x707   :  { %1030 = vmatpush.msrb.mxu3 %v1016_v50 }
 0x708   :  { %910 = vmatpush.msrb.mxu0 %v899_v55  ;;  %v1007_v55 = vld [vmem:[#allocation2 + $0x90] sm:$0xff] }
 0x709   :  { %1031 = vmatpush.msrb.mxu3 %v1015_v45 }
 0x70a   :  { %911 = vmatpush.msrb.mxu0 %v898_v4  ;;  %v1006_v4 = vld [vmem:[#allocation2 + $0x88] sm:$0xff] }
 0x70b   :  { %1032 = vmatpush.msrb.mxu3 %v1014_v27 }
 0x70c   :  { %912 = vmatpush.msrb.mxu0 %v897_v35  ;;  %v1005_v35 = vld [vmem:[#allocation2 + $0x80] sm:$0xff] }
 0x70d   :  { %1033 = vmatpush.msrb.mxu3 %v1013_v3 }
 0x70e   :  { %913 = vmatpush.msrb.mxu0 %v896_v39 }
 0x70f   :  { %1034 = vmatpush.msrb.mxu3 %v1012_v10 }
 0x710   :  { %914 = vmatpush.msrb.mxu0 %v895_v9 }
 0x711   :  { %1035 = vmatpush.msrb.mxu3 %v1011_v12 }
 0x712   :  { %915 = vmatpush.msrb.mxu0 %v894_v2 }
 0x713   :  { %1036 = vmatpush.msrb.mxu3 %v1010_v46 }
 0x714   :  { %916 = vmatpush.msrb.mxu0 %v893_v25 }
 0x715   :  { %1037 = vmatpush.msrb.mxu3 %v1009_v0 }
 0x716   :  { %917 = vmatpush.msrb.mxu0 %v892_v49 }
 0x717   :  { %1038 = vmatpush.msrb.mxu3 %v1008_v1 }
 0x718   :  { %918 = vmatpush.msrb.mxu0 %v891_v43 }
 0x719   :  { %1039 = vmatpush.msrb.mxu3 %v1007_v55 }
 0x71a   :  { %919 = vmatpush.msrb.mxu0 %v890_v22 }
 0x71b   :  { %1040 = vmatpush.msrb.mxu3 %v1006_v4 }
 0x71c   :  { %920 = vmatpush.msrb.mxu0 %v889_v51 }
 0x71d   :  { %921 = vmatmul.f32.vlgmr.msrb.gmra.mxu0 %v1614_v28  ;;  %1041 = vmatpush.msrb.mxu3 %v1005_v35 }
 0x79a   :  { %v922_v19 = vpop.f32.mrf.mxu0 }
 0x79b   :  { %v926_v52 = vmin.f32 %v922_v19, 0.0  ;;  %vm925_vm12 = vcmp.gt.f32.partialorder %v922_v19, 0.0 }
 0x79d   :  { %v927_v8 = vmul.f32 1.442695, %v926_v52 }
 0x79f   :  { %1196 = vpow2.f32 %v927_v8 }
 0x7a5   :  { %v1197_v17 = vpop.eup %1196 }
 0x7a6   :  { %v1061_v13 = vadd.f32 -1.0, %v1197_v17 }
 0x7a8   :  { %v1758_v37 = vsel %vm925_vm12, %v922_v19, %v1061_v13 }
 0x7a9   :  { %v932_v18 = vrot.slane %v1758_v37, 7  ;;  %v947_v23 = vrot.slane %v1758_v37, 1  ;;  %v936_v24 = vrot.slane %v1758_v37, 6  ;;  %v961_v6 = vrot.slane %v1758_v37, 2 }
 0x7aa   :  { %v940_v38 = vrot.slane %v1758_v37, 5  ;;  %v975_v56 = vrot.slane %v1758_v37, 3 }
 0x7ab   :  { %933 = vrot.lane.b32.xlu0 %v932_v18, %s1228_s3  ;;  %v1099_v61 = vpack.i.bf16 %v947_v23, %v1758_v37  ;;  %v1104_v28 = vpack.i.bf16 %v1758_v37, %v932_v18  ;;  %v1109_v58 = vpack.i.bf16 %v932_v18, %v936_v24 }
 0x7ad   :  { %1100 = vrot.lane.b32.xlu2 %v1099_v61, %s1228_s3 }
 0x7b5   :  { %1105 = vrot.lane.b32.xlu2 %v1104_v28, %s1229_s24 }
 0x7bd   :  { %1110 = vrot.lane.b32.xlu2 %v1109_v58, %s1230_s25 }
 0x7c5   :  { %977 = vrot.lane.b32.xlu2 %v961_v6, %s1228_s3 }
 0x7cd   :  { %980 = vrot.lane.b32.xlu2 %v947_v23, %s1229_s24 }
 0x7d5   :  { %983 = vrot.lane.b32.xlu2 %v1758_v37, %s1230_s25 }
 0x807   :  { %v1101_v30 = vpop.permute.xlu2 %1100 }
 0x808   :  { %v1103_v63 = vunpack.i.h.bf16 %v1101_v30  ;;  %v1102_v62 = vunpack.i.l.bf16 %v1101_v30 }
 0x80a   :  { %v972_v26 = vsel %vm459_vm14, %v961_v6, %v1103_v63  ;;  %v958_v47 = vsel %vm459_vm14, %v947_v23, %v1102_v62  ;;  %v1125_v23 = vld [vmem:[%s1810_s7 + $0x1] ss:$0 sm:$0xff] }
 0x80f   :  { %v1106_v48 = vpop.permute.xlu2 %1105 }
 0x810   :  { %v1108_v11 = vunpack.i.h.bf16 %v1106_v48  ;;  %v1107_v53 = vunpack.i.l.bf16 %v1106_v48 }
 0x812   :  { %v973_v16 = vsel %vm461_vm4, %v972_v26, %v1108_v11  ;;  %v959_v36 = vsel %vm461_vm4, %v958_v47, %v1107_v53 }
 0x817   :  { %v1111_v57 = vpop.permute.xlu2 %1110 }
 0x818   :  { %v1113_v34 = vunpack.i.h.bf16 %v1111_v57  ;;  %v1112_v60 = vunpack.i.l.bf16 %v1111_v57 }
 0x81a   :  { %v974_v5 = vsel %vm463_vm13, %v973_v16, %v1113_v34  ;;  %v960_v41 = vsel %vm463_vm13, %v959_v36, %v1112_v60 }
 0x81b   :  { %v1114_v44 = vpack.i.bf16 %v974_v5, %v936_v24  ;;  %v1119_v20 = vpack.i.bf16 %v960_v41, %v940_v38 }
 0x81d   :  { %1115 = vrot.lane.b32.xlu2 %v1114_v44, %s1229_s24  ;;  %1120 = vrot.lane.b32.xlu0 %v1119_v20, %s1230_s25  ;;  %v934_v39 = vpop.permute.xlu0 %933 }
 0x81e   :  { %v944_v49 = vsel %vm459_vm14, %v1758_v37, %v934_v39 }
 0x81f   :  { %v978_v42 = vpop.permute.xlu2 %977 }
 0x820   :  { %v986_v29 = vsel %vm459_vm14, %v975_v56, %v978_v42 }
 0x827   :  { %v981_v54 = vpop.permute.xlu2 %980 }
 0x828   :  { %v987_v40 = vsel %vm461_vm4, %v986_v29, %v981_v54 }
 0x82f   :  { %v984_v31 = vpop.permute.xlu2 %983 }
 0x830   :  { %v988_v59 = vsel %vm463_vm13, %v987_v40, %v984_v31 }
 0x831   :  { %998 = vrot.lane.b32.xlu2 %v988_v59, %s1228_s3 }
 0x877   :  { %v1116_v9 = vpop.permute.xlu2 %1115 }
 0x878   :  { %v1117_v2 = vunpack.i.l.bf16 %v1116_v9  ;;  %v1118_v19 = vunpack.i.h.bf16 %v1116_v9 }
 0x87a   :  { %v945_v51 = vsel %vm461_vm4, %v944_v49, %v1117_v2 }
 0x88b   :  { %v999_v17 = vpop.permute.xlu2 %998 }
 0x88f   :  { %v1121_v25 = vpop.permute.xlu0 %1120 }
 0x890   :  { %v1123_v43 = vunpack.i.h.bf16 %v1121_v25  ;;  %v1122_v22 = vunpack.i.l.bf16 %v1121_v25 }
 0x892   :  { %v946_v52 = vsel %vm463_vm13, %v945_v51, %v1122_v22 }
 0x893   :  { %v1001_v8 = vsel %vm1831_vm7, %v946_v52, %v1123_v43 }
 0x894   :  { %v1002_v13 = vsel %vm1832_vm10, %v1001_v8, %v1118_v19 }
 0x895   :  { %v1003_v18 = vsel %vm1833_vm6, %v1002_v13, %v999_v17 }
 0x896   :  { %1042 = vmatmul.f32.vlgmr.msrb.gmra.mxu3 %v1003_v18 }
 0x919   :  { %v1043_v37 = vpop.f32.mrf.mxu3 }
 0x91a   :  { %v1044_v61 = vadd.f32 %v1125_v23, %v1043_v37 }
 0x91c   :  { %v1046_v28 = vadd.f32 %v1044_v61, %v566_v21 }
 0x91e   :  { %v1047_v24 = vmax.f32 %v1046_v28, 0.0 }
 0x920   :  { %1048 = vst [vmem:[%s1811_s8] sm:$0xf] %v1047_v24 }
 0x921   :  { %1053 = vsyncpa [#allocation3], 1 }

</bundles_post_ra>
